<compile_context>
chip_gen: v5e
topology: v5e:2x2
jax: 0.10.0
libtpu: 0.0.40
codegen_flags: <defaults>
</compile_context>

<pallas_src>
import math
import numpy as np

import jax
import jax.numpy as jnp
from jax.experimental import pallas as pl
from jax.experimental.pallas import tpu as pltpu

# ----- model hyper-parameters (small, consistent with the module) ------------
B = 2          # batch
S = 8          # sequence length
D = 32         # d_model (= layer.size)
H = 4          # attention heads
DK = D // H    # per-head dim
DFF = 64       # feed-forward hidden dim
N_LAYERS = 2   # number of encoder layers
EPS = 1e-6     # LayerNorm eps (Annotated Transformer uses 1e-6)

BS = B * S                     # flattened batch*seq rows
HBS = H * BS                   # head-expanded rows
INV_SQRT_DK = 1.0 / math.sqrt(DK)
LANES = 128                    # slab width (one lane tile)
ROW_ALIGN = 8                  # every packed item starts at an 8-aligned row


# =============================================================================
# Parameter-slab layout (static; shared by the packer and the kernel)
# =============================================================================
def _build_layout():
    layout = {}
    r = 0

    def add(name, rows, cols):
        nonlocal r
        layout[name] = (r, rows, cols)
        r += ((rows + ROW_ALIGN - 1) // ROW_ALIGN) * ROW_ALIGN

    for l in range(N_LAYERS):
        add(f'wqkv{l}', D, 3 * D)      # (32, 96)  fused Q|K|V weights
        add(f'wo{l}',   D, D)          # (32, 32)
        add(f'w1{l}',   D, DFF)        # (32, 64)
        add(f'w2{l}',   DFF, D)        # (64, 32)
        add(f'vec{l}',  8, LANES)      # 8 rows: bqkv, bo, b1, b2, na1, nb1, na2, nb2
    add('final', 8, LANES)             # row 0: fa, row 1: fb
    add('hmask', HBS, D)               # (64, 32) 0/1 head-expansion mask
    return layout, r


LAYOUT, SLAB_ROWS = _build_layout()
# vec-block row indices
_V_BQKV, _V_BO, _V_B1, _V_B2, _V_NA1, _V_NB1, _V_NA2, _V_NB2 = range(8)


def pack_params(params):
    """Pack all weights/biases/norm params + head mask into one (R,128) slab.

    Called ONCE outside the per-call path (plain numpy, no per-call HBM traffic).
    """
    slab = np.zeros((SLAB_ROWS, LANES), np.float32)

    def put(r0, a):
        a = np.asarray(a, np.float32)
        slab[r0:r0 + a.shape[0], :a.shape[1]] = a

    for l in range(N_LAYERS):
        wqkv = np.concatenate([np.asarray(params['wq'][l]),
                               np.asarray(params['wk'][l]),
                               np.asarray(params['wv'][l])], axis=1)        # (32, 96)
        put(LAYOUT[f'wqkv{l}'][0], wqkv)
        put(LAYOUT[f'wo{l}'][0], params['wo'][l])
        put(LAYOUT[f'w1{l}'][0], params['w1'][l])
        put(LAYOUT[f'w2{l}'][0], params['w2'][l])
        v0 = LAYOUT[f'vec{l}'][0]
        bqkv = np.concatenate([np.asarray(params['bq'][l]).reshape(1, D),
                               np.asarray(params['bk'][l]).reshape(1, D),
                               np.asarray(params['bv'][l]).reshape(1, D)], axis=1)
        put(v0 + _V_BQKV, bqkv)
        put(v0 + _V_BO, np.asarray(params['bo'][l]).reshape(1, D))
        put(v0 + _V_B1, np.asarray(params['b1'][l]).reshape(1, DFF))
        put(v0 + _V_B2, np.asarray(params['b2'][l]).reshape(1, D))
        put(v0 + _V_NA1, np.asarray(params['na1'][l]).reshape(1, D))
        put(v0 + _V_NB1, np.asarray(params['nb1'][l]).reshape(1, D))
        put(v0 + _V_NA2, np.asarray(params['na2'][l]).reshape(1, D))
        put(v0 + _V_NB2, np.asarray(params['nb2'][l]).reshape(1, D))
    f0 = LAYOUT['final'][0]
    put(f0 + 0, np.asarray(params['fa']).reshape(1, D))
    put(f0 + 1, np.asarray(params['fb']).reshape(1, D))

    hm = np.zeros((HBS, D), np.float32)      # head mask: row block h keeps cols of head h
    for h in range(H):
        hm[h * BS:(h + 1) * BS, h * DK:(h + 1) * DK] = 1.0
    put(LAYOUT['hmask'][0], hm)
    return jnp.asarray(slab)


# =============================================================================
# Pallas kernel (entire encoder in one call, no grid)
# =============================================================================
def _layer_norm(x, a, b):
    # Annotated-Transformer LayerNorm: a * (x - mean) / (std + eps) + b,
    # with torch's *unbiased* std (divide by D - 1).
    mean = jnp.mean(x, axis=-1, keepdims=True)
    var = jnp.sum((x - mean) ** 2, axis=-1, keepdims=True) * (1.0 / (D - 1))
    std = jnp.sqrt(var)
    return a * (x - mean) / (std + EPS) + b


def encoder_kernel(x_ref, bias_ref, p_ref, out_ref):
    """Full encoder (N_LAYERS layers + final norm), whole batch, one grid step."""

    def blk(name):                               # tile-aligned static view of the slab
        r0, nr, nc = LAYOUT[name]
        return p_ref[r0:r0 + nr, 0:nc]

    def row1(r, nc):                             # single packed vector row
        return p_ref[r:r + 1, 0:nc]

    x = x_ref[...].astype(jnp.float32)           # (BS, D)

    # Hoisted once: head-expansion mask and head-tiled additive attention bias.
    hr = LAYOUT['hmask'][0]
    hmask = p_ref[hr:hr + HBS, 0:D]              # (HBS, D) 0/1
    bias = bias_ref[...]                         # (BS, BS) 0 / -1e9 (batch-block + key pad)
    bias_h = jnp.concatenate([bias] * H, axis=0)  # (HBS, BS), sublane-tile copies only

    for l in range(N_LAYERS):                    # static unroll; weights stay in VMEM
        wqkv = blk(f'wqkv{l}')                   # (D, 3D)
        wo = blk(f'wo{l}')                       # (D, D)
        w1 = blk(f'w1{l}')                       # (D, DFF)
        w2 = blk(f'w2{l}')                       # (DFF, D)
        v0 = LAYOUT[f'vec{l}'][0]
        bqkv = row1(v0 + _V_BQKV, 3 * D)
        bo = row1(v0 + _V_BO, D)
        b1 = row1(v0 + _V_B1, DFF)
        b2 = row1(v0 + _V_B2, D)
        na1 = row1(v0 + _V_NA1, D); nb1 = row1(v0 + _V_NB1, D)
        na2 = row1(v0 + _V_NA2, D); nb2 = row1(v0 + _V_NB2, D)

        # ---------------- sublayer 1: x + SelfAttn(LayerNorm(x)) ----------------
        xn = _layer_norm(x, na1, nb1)
        qkv = jnp.dot(xn, wqkv, preferred_element_type=jnp.float32) + bqkv   # (BS, 3D)
        q = qkv[:, 0:D] * INV_SQRT_DK            # 1/sqrt(d_k) applied in-kernel (VPU)
        k = qkv[:, D:2 * D]
        v = qkv[:, 2 * D:3 * D]

        # Head expansion: row block h of q_exp holds q with only head-h columns kept.
        q_exp = jnp.concatenate([q] * H, axis=0) * hmask                     # (HBS, D)
        # scores[h*BS+i, j] = <q_i, k_j> restricted to head h columns.
        s = jnp.einsum('rd,jd->rj', q_exp, k,
                       preferred_element_type=jnp.float32) + bias_h          # (HBS, BS)
        s = s - jnp.max(s, axis=-1, keepdims=True)
        e = jnp.exp(s)
        attn = e / jnp.sum(e, axis=-1, keepdims=True)                        # (HBS, BS)

        t = jnp.dot(attn, v, preferred_element_type=jnp.float32) * hmask     # (HBS, D)
        # Sum the H row blocks -> concat-of-heads output (each column owned by one head).
        o = t[0:BS, :]
        for h in range(1, H):
            o = o + t[h * BS:(h + 1) * BS, :]                                # (BS, D)
        x = x + jnp.dot(o, wo, preferred_element_type=jnp.float32) + bo

        # ---------------- sublayer 2: x + FFN(LayerNorm(x)) ----------------------
        xn2 = _layer_norm(x, na2, nb2)
        hmid = jnp.maximum(
            jnp.dot(xn2, w1, preferred_element_type=jnp.float32) + b1, 0.0)
        x = x + jnp.dot(hmid, w2, preferred_element_type=jnp.float32) + b2

    # ---------------- final LayerNorm -----------------------------------------
    f0 = LAYOUT['final'][0]
    fa = row1(f0 + 0, D)
    fb = row1(f0 + 1, D)
    out_ref[...] = _layer_norm(x, fa, fb).astype(out_ref.dtype)


# =============================================================================
# Wrapper around pallas_call
# =============================================================================
@jax.jit
def encoder_forward(x, mask, pslab):
    """x: (B, S, D) f32; mask: (B, 1, S) with 1.0 = attend, 0.0 = masked;
    pslab: packed parameter slab from pack_params (built once)."""
    x2d = x.reshape(BS, D)
    # Combined additive bias over flattened keys: 0 where (same batch AND key
    # unmasked), -1e9 otherwise.  Tiny, derived from the runtime mask input.
    key_ok = mask.reshape(BS) > 0.0
    bidx = jnp.arange(BS) // S
    allowed = (bidx[:, None] == bidx[None, :]) & key_ok[None, :]
    bias = jnp.where(allowed, 0.0, -1e9).astype(jnp.float32)        # (BS, BS)

    out2d = pl.pallas_call(
        encoder_kernel,
        out_shape=jax.ShapeDtypeStruct((BS, D), jnp.float32),
        # No grid: one step; activations + packed parameter slab are VMEM-resident.
        in_specs=[pl.BlockSpec(memory_space=pltpu.MemorySpace.VMEM)] * 3,
        out_specs=pl.BlockSpec(memory_space=pltpu.MemorySpace.VMEM),
    )(x2d, bias, pslab)
    return out2d.reshape(B, S, D)


# =============================================================================
# Pure-JAX reference (mirrors the PyTorch module exactly)
# =============================================================================
def _layer_norm_ref(x, a, b):
    mean = x.mean(-1, keepdims=True)
    var = ((x - mean) ** 2).sum(-1, keepdims=True) / (D - 1)
    std = jnp.sqrt(var)
    return a * (x - mean) / (std + EPS) + b


def encoder_ref(x, mask, p):
    for l in range(N_LAYERS):
        xn = _layer_norm_ref(x, p['na1'][l], p['nb1'][l])
        q = xn @ p['wq'][l] + p['bq'][l]
        k = xn @ p['wk'][l] + p['bk'][l]
        v = xn @ p['wv'][l] + p['bv'][l]
        qh = q.reshape(B, S, H, DK).transpose(0, 2, 1, 3)
        kh = k.reshape(B, S, H, DK).transpose(0, 2, 1, 3)
        vh = v.reshape(B, S, H, DK).transpose(0, 2, 1, 3)
        scores = jnp.einsum('bhqd,bhkd->bhqk', qh, kh) / math.sqrt(DK)
        scores = jnp.where(mask[:, None, :, :] == 0.0, -1e9, scores)
        attn = jax.nn.softmax(scores, axis=-1)
        o = jnp.einsum('bhqk,bhkd->bhqd', attn, vh).transpose(0, 2, 1, 3).reshape(B, S, D)
        x = x + (o @ p['wo'][l] + p['bo'][l])
        xn2 = _layer_norm_ref(x, p['na2'][l], p['nb2'][l])
        x = x + (jnp.maximum(xn2 @ p['w1'][l] + p['b1'][l], 0.0) @ p['w2'][l] + p['b2'][l])
    return _layer_norm_ref(x, p['fa'], p['fb'])


# =============================================================================
# Parameter construction + driver
# =============================================================================
def make_params(key):
    ks = jax.random.split(key, 18)

    def nrm(k, shape, s):
        return s * jax.random.normal(k, shape, jnp.float32)

    return {
        'wq': nrm(ks[0], (N_LAYERS, D, D), 0.1),
        'bq': nrm(ks[1], (N_LAYERS, 1, D), 0.02),
        'wk': nrm(ks[2], (N_LAYERS, D, D), 0.1),
        'bk': nrm(ks[3], (N_LAYERS, 1, D), 0.02),
        'wv': nrm(ks[4], (N_LAYERS, D, D), 0.1),
        'bv': nrm(ks[5], (N_LAYERS, 1, D), 0.02),
        'wo': nrm(ks[6], (N_LAYERS, D, D), 0.1),
        'bo': nrm(ks[7], (N_LAYERS, 1, D), 0.02),
        'w1': nrm(ks[8], (N_LAYERS, D, DFF), 0.1),
        'b1': nrm(ks[9], (N_LAYERS, 1, DFF), 0.02),
        'w2': nrm(ks[10], (N_LAYERS, DFF, D), 0.1),
        'b2': nrm(ks[11], (N_LAYERS, 1, D), 0.02),
        'na1': 1.0 + nrm(ks[12], (N_LAYERS, 1, D), 0.05),
        'nb1': nrm(ks[13], (N_LAYERS, 1, D), 0.05),
        'na2': 1.0 + nrm(ks[14], (N_LAYERS, 1, D), 0.05),
        'nb2': nrm(ks[15], (N_LAYERS, 1, D), 0.05),
        'fa': 1.0 + nrm(ks[16], (1, D), 0.05),
        'fb': nrm(ks[17], (1, D), 0.05),
    }


if __name__ == "__main__":
    key = jax.random.PRNGKey(0)
    key, kx = jax.random.split(key)
    x = jax.random.normal(kx, (B, S, D), jnp.float32)

    # mask: batch 0 attends to all 8 positions, batch 1 only to the first 6
    lengths = jnp.array([S, 6])
    mask = (jnp.arange(S)[None, :] < lengths[:, None]).astype(jnp.float32)[:, None, :]

    params = make_params(key)
    pslab = pack_params(params)        # one-time packing, outside the per-call path

    out = jax.block_until_ready(encoder_forward(x, mask, pslab))
    ref = jax.block_until_ready(encoder_ref(x, mask, params))

    assert out.shape == (B, S, D)
    assert np.all(np.isfinite(np.asarray(out)))
    np.testing.assert_allclose(np.asarray(out), np.asarray(ref), rtol=1e-3, atol=1e-3)

    print("KERNEL_OK")
</pallas_src>

<mosaic_0001>
module attributes {stable_mosaic.version = 11 : i64} {
  func.func @encoder_kernel(%arg0: memref<16x32xf32, #tpu.memory_space<vmem>>, %arg1: memref<16x16xf32, #tpu.memory_space<vmem>>, %arg2: memref<408x128xf32, #tpu.memory_space<vmem>>, %arg3: memref<16x32xf32, #tpu.memory_space<vmem>>) attributes {dimension_semantics = [], scalar_prefetch = 0 : i64, scratch_operands = 0 : i64, tpu.core_type = #tpu.core_type<tc>} {
    %c0 = arith.constant 0 : index
    %c0_0 = arith.constant 0 : index
    %0 = vector.load %arg0[%c0, %c0_0] : memref<16x32xf32, #tpu.memory_space<vmem>>, vector<16x32xf32>
    %c344 = arith.constant 344 : index
    %c0_1 = arith.constant 0 : index
    %1 = vector.load %arg2[%c344, %c0_1] : memref<408x128xf32, #tpu.memory_space<vmem>>, vector<64x32xf32>
    %c0_2 = arith.constant 0 : index
    %c0_3 = arith.constant 0 : index
    %2 = vector.load %arg1[%c0_2, %c0_3] : memref<16x16xf32, #tpu.memory_space<vmem>>, vector<16x16xf32>
    %3 = tpu.concatenate %2, %2, %2, %2 in 0 : vector<16x16xf32>, vector<16x16xf32>, vector<16x16xf32>, vector<16x16xf32> -> vector<64x16xf32>
    %c0_4 = arith.constant 0 : index
    %c0_5 = arith.constant 0 : index
    %4 = vector.load %arg2[%c0_4, %c0_5] : memref<408x128xf32, #tpu.memory_space<vmem>>, vector<32x96xf32>
    %c32 = arith.constant 32 : index
    %c0_6 = arith.constant 0 : index
    %5 = vector.load %arg2[%c32, %c0_6] : memref<408x128xf32, #tpu.memory_space<vmem>>, vector<32x32xf32>
    %c64 = arith.constant 64 : index
    %c0_7 = arith.constant 0 : index
    %6 = vector.load %arg2[%c64, %c0_7] : memref<408x128xf32, #tpu.memory_space<vmem>>, vector<32x64xf32>
    %c96 = arith.constant 96 : index
    %c0_8 = arith.constant 0 : index
    %7 = vector.load %arg2[%c96, %c0_8] : memref<408x128xf32, #tpu.memory_space<vmem>>, vector<64x32xf32>
    %c160 = arith.constant 160 : index
    %c0_9 = arith.constant 0 : index
    %8 = vector.load %arg2[%c160, %c0_9] : memref<408x128xf32, #tpu.memory_space<vmem>>, vector<1x96xf32>
    %c161 = arith.constant 161 : index
    %c0_10 = arith.constant 0 : index
    %9 = vector.load %arg2[%c161, %c0_10] : memref<408x128xf32, #tpu.memory_space<vmem>>, vector<1x32xf32>
    %c162 = arith.constant 162 : index
    %c0_11 = arith.constant 0 : index
    %10 = vector.load %arg2[%c162, %c0_11] : memref<408x128xf32, #tpu.memory_space<vmem>>, vector<1x64xf32>
    %c163 = arith.constant 163 : index
    %c0_12 = arith.constant 0 : index
    %11 = vector.load %arg2[%c163, %c0_12] : memref<408x128xf32, #tpu.memory_space<vmem>>, vector<1x32xf32>
    %c164 = arith.constant 164 : index
    %c0_13 = arith.constant 0 : index
    %12 = vector.load %arg2[%c164, %c0_13] : memref<408x128xf32, #tpu.memory_space<vmem>>, vector<1x32xf32>
    %c165 = arith.constant 165 : index
    %c0_14 = arith.constant 0 : index
    %13 = vector.load %arg2[%c165, %c0_14] : memref<408x128xf32, #tpu.memory_space<vmem>>, vector<1x32xf32>
    %c166 = arith.constant 166 : index
    %c0_15 = arith.constant 0 : index
    %14 = vector.load %arg2[%c166, %c0_15] : memref<408x128xf32, #tpu.memory_space<vmem>>, vector<1x32xf32>
    %c167 = arith.constant 167 : index
    %c0_16 = arith.constant 0 : index
    %15 = vector.load %arg2[%c167, %c0_16] : memref<408x128xf32, #tpu.memory_space<vmem>>, vector<1x32xf32>
    %cst = arith.constant dense<0.000000e+00> : vector<16xf32>
    %16 = vector.multi_reduction <add>, %0, %cst [1] : vector<16x32xf32> to vector<16xf32>
    %17 = vector.shape_cast %16 : vector<16xf32> to vector<16x1xf32>
    %cst_17 = arith.constant 3.200000e+01 : f32
    %18 = vector.broadcast %cst_17 : f32 to vector<16x1xf32>
    %19 = arith.divf %17, %18 : vector<16x1xf32>
    %20 = vector.broadcast %19 : vector<16x1xf32> to vector<16x32xf32>
    %21 = arith.subf %0, %20 : vector<16x32xf32>
    %22 = arith.mulf %21, %21 : vector<16x32xf32>
    %cst_18 = arith.constant dense<0.000000e+00> : vector<16xf32>
    %23 = vector.multi_reduction <add>, %22, %cst_18 [1] : vector<16x32xf32> to vector<16xf32>
    %24 = vector.shape_cast %23 : vector<16xf32> to vector<16x1xf32>
    %cst_19 = arith.constant 0.0322580636 : f32
    %25 = vector.broadcast %cst_19 : f32 to vector<16x1xf32>
    %26 = arith.mulf %24, %25 : vector<16x1xf32>
    %27 = math.sqrt %26 : vector<16x1xf32>
    %28 = vector.broadcast %19 : vector<16x1xf32> to vector<16x32xf32>
    %29 = arith.subf %0, %28 : vector<16x32xf32>
    %30 = vector.broadcast %12 : vector<1x32xf32> to vector<16x32xf32>
    %31 = arith.mulf %30, %29 : vector<16x32xf32>
    %cst_20 = arith.constant 9.99999997E-7 : f32
    %32 = vector.broadcast %cst_20 : f32 to vector<16x1xf32>
    %33 = arith.addf %27, %32 : vector<16x1xf32>
    %34 = vector.broadcast %33 : vector<16x1xf32> to vector<16x32xf32>
    %35 = arith.divf %31, %34 : vector<16x32xf32>
    %36 = vector.broadcast %13 : vector<1x32xf32> to vector<16x32xf32>
    %37 = arith.addf %35, %36 : vector<16x32xf32>
    %cst_21 = arith.constant dense<0.000000e+00> : vector<16x96xf32>
    %38 = tpu.matmul %37, %4, %cst_21 {dimension_numbers = #tpu.dot_dimension_numbers<[1], [0], [0], [1], [0, 0, 1, 1], [], []>} : vector<16x32xf32>, vector<32x96xf32>, vector<16x96xf32> -> vector<16x96xf32>
    %39 = vector.broadcast %8 : vector<1x96xf32> to vector<16x96xf32>
    %40 = arith.addf %38, %39 : vector<16x96xf32>
    %41 = vector.extract_strided_slice %40 {offsets = [0, 0], sizes = [16, 32], strides = [1, 1]} : vector<16x96xf32> to vector<16x32xf32>
    %cst_22 = arith.constant 0.353553385 : f32
    %42 = vector.broadcast %cst_22 : f32 to vector<16x32xf32>
    %43 = arith.mulf %41, %42 : vector<16x32xf32>
    %44 = vector.extract_strided_slice %40 {offsets = [0, 32], sizes = [16, 32], strides = [1, 1]} : vector<16x96xf32> to vector<16x32xf32>
    %45 = vector.extract_strided_slice %40 {offsets = [0, 64], sizes = [16, 32], strides = [1, 1]} : vector<16x96xf32> to vector<16x32xf32>
    %46 = tpu.concatenate %43, %43, %43, %43 in 0 : vector<16x32xf32>, vector<16x32xf32>, vector<16x32xf32>, vector<16x32xf32> -> vector<64x32xf32>
    %47 = arith.mulf %46, %1 : vector<64x32xf32>
    "tpu.trace_start"() <{level = 10 : i32, message = "rd,jd->rj"}> : () -> ()
    %cst_23 = arith.constant dense<0.000000e+00> : vector<64x16xf32>
    %48 = tpu.matmul %47, %44, %cst_23 {dimension_numbers = #tpu.dot_dimension_numbers<[1], [1], [0], [0], [0, 0, 1, 0], [], []>} : vector<64x32xf32>, vector<16x32xf32>, vector<64x16xf32> -> vector<64x16xf32>
    "tpu.trace_stop"() : () -> ()
    %49 = arith.addf %48, %3 : vector<64x16xf32>
    %cst_24 = arith.constant dense<0xFF800000> : vector<64xf32>
    %50 = vector.multi_reduction <maximumf>, %49, %cst_24 [1] : vector<64x16xf32> to vector<64xf32>
    %51 = vector.shape_cast %50 : vector<64xf32> to vector<64x1xf32>
    %52 = vector.broadcast %51 : vector<64x1xf32> to vector<64x16xf32>
    %53 = arith.subf %49, %52 : vector<64x16xf32>
    %54 = math.exp %53 : vector<64x16xf32>
    %cst_25 = arith.constant dense<0.000000e+00> : vector<64xf32>
    %55 = vector.multi_reduction <add>, %54, %cst_25 [1] : vector<64x16xf32> to vector<64xf32>
    %56 = vector.shape_cast %55 : vector<64xf32> to vector<64x1xf32>
    %57 = vector.broadcast %56 : vector<64x1xf32> to vector<64x16xf32>
    %58 = arith.divf %54, %57 : vector<64x16xf32>
    %cst_26 = arith.constant dense<0.000000e+00> : vector<64x32xf32>
    %59 = tpu.matmul %58, %45, %cst_26 {dimension_numbers = #tpu.dot_dimension_numbers<[1], [0], [0], [1], [0, 0, 1, 1], [], []>} : vector<64x16xf32>, vector<16x32xf32>, vector<64x32xf32> -> vector<64x32xf32>
    %60 = arith.mulf %59, %1 : vector<64x32xf32>
    %61 = vector.extract_strided_slice %60 {offsets = [0, 0], sizes = [16, 32], strides = [1, 1]} : vector<64x32xf32> to vector<16x32xf32>
    %62 = vector.extract_strided_slice %60 {offsets = [16, 0], sizes = [16, 32], strides = [1, 1]} : vector<64x32xf32> to vector<16x32xf32>
    %63 = arith.addf %61, %62 : vector<16x32xf32>
    %64 = vector.extract_strided_slice %60 {offsets = [32, 0], sizes = [16, 32], strides = [1, 1]} : vector<64x32xf32> to vector<16x32xf32>
    %65 = arith.addf %63, %64 : vector<16x32xf32>
    %66 = vector.extract_strided_slice %60 {offsets = [48, 0], sizes = [16, 32], strides = [1, 1]} : vector<64x32xf32> to vector<16x32xf32>
    %67 = arith.addf %65, %66 : vector<16x32xf32>
    %cst_27 = arith.constant dense<0.000000e+00> : vector<16x32xf32>
    %68 = tpu.matmul %67, %5, %cst_27 {dimension_numbers = #tpu.dot_dimension_numbers<[1], [0], [0], [1], [0, 0, 1, 1], [], []>} : vector<16x32xf32>, vector<32x32xf32>, vector<16x32xf32> -> vector<16x32xf32>
    %69 = arith.addf %0, %68 : vector<16x32xf32>
    %70 = vector.broadcast %9 : vector<1x32xf32> to vector<16x32xf32>
    %71 = arith.addf %69, %70 : vector<16x32xf32>
    %cst_28 = arith.constant dense<0.000000e+00> : vector<16xf32>
    %72 = vector.multi_reduction <add>, %71, %cst_28 [1] : vector<16x32xf32> to vector<16xf32>
    %73 = vector.shape_cast %72 : vector<16xf32> to vector<16x1xf32>
    %cst_29 = arith.constant 3.200000e+01 : f32
    %74 = vector.broadcast %cst_29 : f32 to vector<16x1xf32>
    %75 = arith.divf %73, %74 : vector<16x1xf32>
    %76 = vector.broadcast %75 : vector<16x1xf32> to vector<16x32xf32>
    %77 = arith.subf %71, %76 : vector<16x32xf32>
    %78 = arith.mulf %77, %77 : vector<16x32xf32>
    %cst_30 = arith.constant dense<0.000000e+00> : vector<16xf32>
    %79 = vector.multi_reduction <add>, %78, %cst_30 [1] : vector<16x32xf32> to vector<16xf32>
    %80 = vector.shape_cast %79 : vector<16xf32> to vector<16x1xf32>
    %cst_31 = arith.constant 0.0322580636 : f32
    %81 = vector.broadcast %cst_31 : f32 to vector<16x1xf32>
    %82 = arith.mulf %80, %81 : vector<16x1xf32>
    %83 = math.sqrt %82 : vector<16x1xf32>
    %84 = vector.broadcast %75 : vector<16x1xf32> to vector<16x32xf32>
    %85 = arith.subf %71, %84 : vector<16x32xf32>
    %86 = vector.broadcast %14 : vector<1x32xf32> to vector<16x32xf32>
    %87 = arith.mulf %86, %85 : vector<16x32xf32>
    %cst_32 = arith.constant 9.99999997E-7 : f32
    %88 = vector.broadcast %cst_32 : f32 to vector<16x1xf32>
    %89 = arith.addf %83, %88 : vector<16x1xf32>
    %90 = vector.broadcast %89 : vector<16x1xf32> to vector<16x32xf32>
    %91 = arith.divf %87, %90 : vector<16x32xf32>
    %92 = vector.broadcast %15 : vector<1x32xf32> to vector<16x32xf32>
    %93 = arith.addf %91, %92 : vector<16x32xf32>
    %cst_33 = arith.constant dense<0.000000e+00> : vector<16x64xf32>
    %94 = tpu.matmul %93, %6, %cst_33 {dimension_numbers = #tpu.dot_dimension_numbers<[1], [0], [0], [1], [0, 0, 1, 1], [], []>} : vector<16x32xf32>, vector<32x64xf32>, vector<16x64xf32> -> vector<16x64xf32>
    %95 = vector.broadcast %10 : vector<1x64xf32> to vector<16x64xf32>
    %96 = arith.addf %94, %95 : vector<16x64xf32>
    %cst_34 = arith.constant 0.000000e+00 : f32
    %97 = vector.broadcast %cst_34 : f32 to vector<16x64xf32>
    %98 = arith.maximumf %96, %97 : vector<16x64xf32>
    %cst_35 = arith.constant dense<0.000000e+00> : vector<16x32xf32>
    %99 = tpu.matmul %98, %7, %cst_35 {dimension_numbers = #tpu.dot_dimension_numbers<[1], [0], [0], [1], [0, 0, 1, 1], [], []>} : vector<16x64xf32>, vector<64x32xf32>, vector<16x32xf32> -> vector<16x32xf32>
    %100 = arith.addf %71, %99 : vector<16x32xf32>
    %101 = vector.broadcast %11 : vector<1x32xf32> to vector<16x32xf32>
    %102 = arith.addf %100, %101 : vector<16x32xf32>
    %c168 = arith.constant 168 : index
    %c0_36 = arith.constant 0 : index
    %103 = vector.load %arg2[%c168, %c0_36] : memref<408x128xf32, #tpu.memory_space<vmem>>, vector<32x96xf32>
    %c200 = arith.constant 200 : index
    %c0_37 = arith.constant 0 : index
    %104 = vector.load %arg2[%c200, %c0_37] : memref<408x128xf32, #tpu.memory_space<vmem>>, vector<32x32xf32>
    %c232 = arith.constant 232 : index
    %c0_38 = arith.constant 0 : index
    %105 = vector.load %arg2[%c232, %c0_38] : memref<408x128xf32, #tpu.memory_space<vmem>>, vector<32x64xf32>
    %c264 = arith.constant 264 : index
    %c0_39 = arith.constant 0 : index
    %106 = vector.load %arg2[%c264, %c0_39] : memref<408x128xf32, #tpu.memory_space<vmem>>, vector<64x32xf32>
    %c328 = arith.constant 328 : index
    %c0_40 = arith.constant 0 : index
    %107 = vector.load %arg2[%c328, %c0_40] : memref<408x128xf32, #tpu.memory_space<vmem>>, vector<1x96xf32>
    %c329 = arith.constant 329 : index
    %c0_41 = arith.constant 0 : index
    %108 = vector.load %arg2[%c329, %c0_41] : memref<408x128xf32, #tpu.memory_space<vmem>>, vector<1x32xf32>
    %c330 = arith.constant 330 : index
    %c0_42 = arith.constant 0 : index
    %109 = vector.load %arg2[%c330, %c0_42] : memref<408x128xf32, #tpu.memory_space<vmem>>, vector<1x64xf32>
    %c331 = arith.constant 331 : index
    %c0_43 = arith.constant 0 : index
    %110 = vector.load %arg2[%c331, %c0_43] : memref<408x128xf32, #tpu.memory_space<vmem>>, vector<1x32xf32>
    %c332 = arith.constant 332 : index
    %c0_44 = arith.constant 0 : index
    %111 = vector.load %arg2[%c332, %c0_44] : memref<408x128xf32, #tpu.memory_space<vmem>>, vector<1x32xf32>
    %c333 = arith.constant 333 : index
    %c0_45 = arith.constant 0 : index
    %112 = vector.load %arg2[%c333, %c0_45] : memref<408x128xf32, #tpu.memory_space<vmem>>, vector<1x32xf32>
    %c334 = arith.constant 334 : index
    %c0_46 = arith.constant 0 : index
    %113 = vector.load %arg2[%c334, %c0_46] : memref<408x128xf32, #tpu.memory_space<vmem>>, vector<1x32xf32>
    %c335 = arith.constant 335 : index
    %c0_47 = arith.constant 0 : index
    %114 = vector.load %arg2[%c335, %c0_47] : memref<408x128xf32, #tpu.memory_space<vmem>>, vector<1x32xf32>
    %cst_48 = arith.constant dense<0.000000e+00> : vector<16xf32>
    %115 = vector.multi_reduction <add>, %102, %cst_48 [1] : vector<16x32xf32> to vector<16xf32>
    %116 = vector.shape_cast %115 : vector<16xf32> to vector<16x1xf32>
    %cst_49 = arith.constant 3.200000e+01 : f32
    %117 = vector.broadcast %cst_49 : f32 to vector<16x1xf32>
    %118 = arith.divf %116, %117 : vector<16x1xf32>
    %119 = vector.broadcast %118 : vector<16x1xf32> to vector<16x32xf32>
    %120 = arith.subf %102, %119 : vector<16x32xf32>
    %121 = arith.mulf %120, %120 : vector<16x32xf32>
    %cst_50 = arith.constant dense<0.000000e+00> : vector<16xf32>
    %122 = vector.multi_reduction <add>, %121, %cst_50 [1] : vector<16x32xf32> to vector<16xf32>
    %123 = vector.shape_cast %122 : vector<16xf32> to vector<16x1xf32>
    %cst_51 = arith.constant 0.0322580636 : f32
    %124 = vector.broadcast %cst_51 : f32 to vector<16x1xf32>
    %125 = arith.mulf %123, %124 : vector<16x1xf32>
    %126 = math.sqrt %125 : vector<16x1xf32>
    %127 = vector.broadcast %118 : vector<16x1xf32> to vector<16x32xf32>
    %128 = arith.subf %102, %127 : vector<16x32xf32>
    %129 = vector.broadcast %111 : vector<1x32xf32> to vector<16x32xf32>
    %130 = arith.mulf %129, %128 : vector<16x32xf32>
    %cst_52 = arith.constant 9.99999997E-7 : f32
    %131 = vector.broadcast %cst_52 : f32 to vector<16x1xf32>
    %132 = arith.addf %126, %131 : vector<16x1xf32>
    %133 = vector.broadcast %132 : vector<16x1xf32> to vector<16x32xf32>
    %134 = arith.divf %130, %133 : vector<16x32xf32>
    %135 = vector.broadcast %112 : vector<1x32xf32> to vector<16x32xf32>
    %136 = arith.addf %134, %135 : vector<16x32xf32>
    %cst_53 = arith.constant dense<0.000000e+00> : vector<16x96xf32>
    %137 = tpu.matmul %136, %103, %cst_53 {dimension_numbers = #tpu.dot_dimension_numbers<[1], [0], [0], [1], [0, 0, 1, 1], [], []>} : vector<16x32xf32>, vector<32x96xf32>, vector<16x96xf32> -> vector<16x96xf32>
    %138 = vector.broadcast %107 : vector<1x96xf32> to vector<16x96xf32>
    %139 = arith.addf %137, %138 : vector<16x96xf32>
    %140 = vector.extract_strided_slice %139 {offsets = [0, 0], sizes = [16, 32], strides = [1, 1]} : vector<16x96xf32> to vector<16x32xf32>
    %cst_54 = arith.constant 0.353553385 : f32
    %141 = vector.broadcast %cst_54 : f32 to vector<16x32xf32>
    %142 = arith.mulf %140, %141 : vector<16x32xf32>
    %143 = vector.extract_strided_slice %139 {offsets = [0, 32], sizes = [16, 32], strides = [1, 1]} : vector<16x96xf32> to vector<16x32xf32>
    %144 = vector.extract_strided_slice %139 {offsets = [0, 64], sizes = [16, 32], strides = [1, 1]} : vector<16x96xf32> to vector<16x32xf32>
    %145 = tpu.concatenate %142, %142, %142, %142 in 0 : vector<16x32xf32>, vector<16x32xf32>, vector<16x32xf32>, vector<16x32xf32> -> vector<64x32xf32>
    %146 = arith.mulf %145, %1 : vector<64x32xf32>
    "tpu.trace_start"() <{level = 10 : i32, message = "rd,jd->rj"}> : () -> ()
    %cst_55 = arith.constant dense<0.000000e+00> : vector<64x16xf32>
    %147 = tpu.matmul %146, %143, %cst_55 {dimension_numbers = #tpu.dot_dimension_numbers<[1], [1], [0], [0], [0, 0, 1, 0], [], []>} : vector<64x32xf32>, vector<16x32xf32>, vector<64x16xf32> -> vector<64x16xf32>
    "tpu.trace_stop"() : () -> ()
    %148 = arith.addf %147, %3 : vector<64x16xf32>
    %cst_56 = arith.constant dense<0xFF800000> : vector<64xf32>
    %149 = vector.multi_reduction <maximumf>, %148, %cst_56 [1] : vector<64x16xf32> to vector<64xf32>
    %150 = vector.shape_cast %149 : vector<64xf32> to vector<64x1xf32>
    %151 = vector.broadcast %150 : vector<64x1xf32> to vector<64x16xf32>
    %152 = arith.subf %148, %151 : vector<64x16xf32>
    %153 = math.exp %152 : vector<64x16xf32>
    %cst_57 = arith.constant dense<0.000000e+00> : vector<64xf32>
    %154 = vector.multi_reduction <add>, %153, %cst_57 [1] : vector<64x16xf32> to vector<64xf32>
    %155 = vector.shape_cast %154 : vector<64xf32> to vector<64x1xf32>
    %156 = vector.broadcast %155 : vector<64x1xf32> to vector<64x16xf32>
    %157 = arith.divf %153, %156 : vector<64x16xf32>
    %cst_58 = arith.constant dense<0.000000e+00> : vector<64x32xf32>
    %158 = tpu.matmul %157, %144, %cst_58 {dimension_numbers = #tpu.dot_dimension_numbers<[1], [0], [0], [1], [0, 0, 1, 1], [], []>} : vector<64x16xf32>, vector<16x32xf32>, vector<64x32xf32> -> vector<64x32xf32>
    %159 = arith.mulf %158, %1 : vector<64x32xf32>
    %160 = vector.extract_strided_slice %159 {offsets = [0, 0], sizes = [16, 32], strides = [1, 1]} : vector<64x32xf32> to vector<16x32xf32>
    %161 = vector.extract_strided_slice %159 {offsets = [16, 0], sizes = [16, 32], strides = [1, 1]} : vector<64x32xf32> to vector<16x32xf32>
    %162 = arith.addf %160, %161 : vector<16x32xf32>
    %163 = vector.extract_strided_slice %159 {offsets = [32, 0], sizes = [16, 32], strides = [1, 1]} : vector<64x32xf32> to vector<16x32xf32>
    %164 = arith.addf %162, %163 : vector<16x32xf32>
    %165 = vector.extract_strided_slice %159 {offsets = [48, 0], sizes = [16, 32], strides = [1, 1]} : vector<64x32xf32> to vector<16x32xf32>
    %166 = arith.addf %164, %165 : vector<16x32xf32>
    %cst_59 = arith.constant dense<0.000000e+00> : vector<16x32xf32>
    %167 = tpu.matmul %166, %104, %cst_59 {dimension_numbers = #tpu.dot_dimension_numbers<[1], [0], [0], [1], [0, 0, 1, 1], [], []>} : vector<16x32xf32>, vector<32x32xf32>, vector<16x32xf32> -> vector<16x32xf32>
    %168 = arith.addf %102, %167 : vector<16x32xf32>
    %169 = vector.broadcast %108 : vector<1x32xf32> to vector<16x32xf32>
    %170 = arith.addf %168, %169 : vector<16x32xf32>
    %cst_60 = arith.constant dense<0.000000e+00> : vector<16xf32>
    %171 = vector.multi_reduction <add>, %170, %cst_60 [1] : vector<16x32xf32> to vector<16xf32>
    %172 = vector.shape_cast %171 : vector<16xf32> to vector<16x1xf32>
    %cst_61 = arith.constant 3.200000e+01 : f32
    %173 = vector.broadcast %cst_61 : f32 to vector<16x1xf32>
    %174 = arith.divf %172, %173 : vector<16x1xf32>
    %175 = vector.broadcast %174 : vector<16x1xf32> to vector<16x32xf32>
    %176 = arith.subf %170, %175 : vector<16x32xf32>
    %177 = arith.mulf %176, %176 : vector<16x32xf32>
    %cst_62 = arith.constant dense<0.000000e+00> : vector<16xf32>
    %178 = vector.multi_reduction <add>, %177, %cst_62 [1] : vector<16x32xf32> to vector<16xf32>
    %179 = vector.shape_cast %178 : vector<16xf32> to vector<16x1xf32>
    %cst_63 = arith.constant 0.0322580636 : f32
    %180 = vector.broadcast %cst_63 : f32 to vector<16x1xf32>
    %181 = arith.mulf %179, %180 : vector<16x1xf32>
    %182 = math.sqrt %181 : vector<16x1xf32>
    %183 = vector.broadcast %174 : vector<16x1xf32> to vector<16x32xf32>
    %184 = arith.subf %170, %183 : vector<16x32xf32>
    %185 = vector.broadcast %113 : vector<1x32xf32> to vector<16x32xf32>
    %186 = arith.mulf %185, %184 : vector<16x32xf32>
    %cst_64 = arith.constant 9.99999997E-7 : f32
    %187 = vector.broadcast %cst_64 : f32 to vector<16x1xf32>
    %188 = arith.addf %182, %187 : vector<16x1xf32>
    %189 = vector.broadcast %188 : vector<16x1xf32> to vector<16x32xf32>
    %190 = arith.divf %186, %189 : vector<16x32xf32>
    %191 = vector.broadcast %114 : vector<1x32xf32> to vector<16x32xf32>
    %192 = arith.addf %190, %191 : vector<16x32xf32>
    %cst_65 = arith.constant dense<0.000000e+00> : vector<16x64xf32>
    %193 = tpu.matmul %192, %105, %cst_65 {dimension_numbers = #tpu.dot_dimension_numbers<[1], [0], [0], [1], [0, 0, 1, 1], [], []>} : vector<16x32xf32>, vector<32x64xf32>, vector<16x64xf32> -> vector<16x64xf32>
    %194 = vector.broadcast %109 : vector<1x64xf32> to vector<16x64xf32>
    %195 = arith.addf %193, %194 : vector<16x64xf32>
    %cst_66 = arith.constant 0.000000e+00 : f32
    %196 = vector.broadcast %cst_66 : f32 to vector<16x64xf32>
    %197 = arith.maximumf %195, %196 : vector<16x64xf32>
    %cst_67 = arith.constant dense<0.000000e+00> : vector<16x32xf32>
    %198 = tpu.matmul %197, %106, %cst_67 {dimension_numbers = #tpu.dot_dimension_numbers<[1], [0], [0], [1], [0, 0, 1, 1], [], []>} : vector<16x64xf32>, vector<64x32xf32>, vector<16x32xf32> -> vector<16x32xf32>
    %199 = arith.addf %170, %198 : vector<16x32xf32>
    %200 = vector.broadcast %110 : vector<1x32xf32> to vector<16x32xf32>
    %201 = arith.addf %199, %200 : vector<16x32xf32>
    %c336 = arith.constant 336 : index
    %c0_68 = arith.constant 0 : index
    %202 = vector.load %arg2[%c336, %c0_68] : memref<408x128xf32, #tpu.memory_space<vmem>>, vector<1x32xf32>
    %c337 = arith.constant 337 : index
    %c0_69 = arith.constant 0 : index
    %203 = vector.load %arg2[%c337, %c0_69] : memref<408x128xf32, #tpu.memory_space<vmem>>, vector<1x32xf32>
    %cst_70 = arith.constant dense<0.000000e+00> : vector<16xf32>
    %204 = vector.multi_reduction <add>, %201, %cst_70 [1] : vector<16x32xf32> to vector<16xf32>
    %205 = vector.shape_cast %204 : vector<16xf32> to vector<16x1xf32>
    %cst_71 = arith.constant 3.200000e+01 : f32
    %206 = vector.broadcast %cst_71 : f32 to vector<16x1xf32>
    %207 = arith.divf %205, %206 : vector<16x1xf32>
    %208 = vector.broadcast %207 : vector<16x1xf32> to vector<16x32xf32>
    %209 = arith.subf %201, %208 : vector<16x32xf32>
    %210 = arith.mulf %209, %209 : vector<16x32xf32>
    %cst_72 = arith.constant dense<0.000000e+00> : vector<16xf32>
    %211 = vector.multi_reduction <add>, %210, %cst_72 [1] : vector<16x32xf32> to vector<16xf32>
    %212 = vector.shape_cast %211 : vector<16xf32> to vector<16x1xf32>
    %cst_73 = arith.constant 0.0322580636 : f32
    %213 = vector.broadcast %cst_73 : f32 to vector<16x1xf32>
    %214 = arith.mulf %212, %213 : vector<16x1xf32>
    %215 = math.sqrt %214 : vector<16x1xf32>
    %216 = vector.broadcast %207 : vector<16x1xf32> to vector<16x32xf32>
    %217 = arith.subf %201, %216 : vector<16x32xf32>
    %218 = vector.broadcast %202 : vector<1x32xf32> to vector<16x32xf32>
    %219 = arith.mulf %218, %217 : vector<16x32xf32>
    %cst_74 = arith.constant 9.99999997E-7 : f32
    %220 = vector.broadcast %cst_74 : f32 to vector<16x1xf32>
    %221 = arith.addf %215, %220 : vector<16x1xf32>
    %222 = vector.broadcast %221 : vector<16x1xf32> to vector<16x32xf32>
    %223 = arith.divf %219, %222 : vector<16x32xf32>
    %224 = vector.broadcast %203 : vector<1x32xf32> to vector<16x32xf32>
    %225 = arith.addf %223, %224 : vector<16x32xf32>
    %c0_75 = arith.constant 0 : index
    %c0_76 = arith.constant 0 : index
    %226 = vector.load %arg3[%c0_75, %c0_76] : memref<16x32xf32, #tpu.memory_space<vmem>>, vector<16x32xf32>
    tpu.vector_store %arg3[%c0_75, %c0_76], %225 {strides = array<i32>} : memref<16x32xf32, #tpu.memory_space<vmem>>, vector<16x32xf32>,
    return
  }
}

</mosaic_0001>

<bundles_post_ra>
// kernel: encoder_forward.1
= control target key start
LH: loop header
LB: loop body
LE: loop exit
PB: predicated region body
PF: predicated region fallthrough
CT: control target
= control target key end

     0   :  { %8 = vsyncpa [#allocation3], 0  ;;  %s2208_s0 = inlined_call_operand.vmem [shape: f32[16,32], index: 0, kind: input, shape index: {}]   ;;  %s2209_s1 = inlined_call_operand.vmem [shape: f32[16,16], index: 1, kind: input, shape index: {}]   ;;  %s2210_s2 = inlined_call_operand.hbm [shape: f32[408,128], index: 2, kind: input, shape index: {}]   ;;  %s2211_s3 = inlined_call_operand.hbm [shape: f32[16,32], index: 3, kind: output, shape index: {}]  }
   0x1   :  { %9 = vsyncpa [#allocation4], 0  ;;  %s18_s14 = sshll.u32 %s2210_s2, 4  ;;  %s1781_s15 = smov [#allocation2]   ;;  %s19_s14 = int_to_ptr.hbm [resolvable:$true] %s18_s14 }
   0x2   :  { %s20_s16 = sshll.u32 %s1781_s15, 4  ;;  %s1782_s17 = smov 128   ;;  %s21_s16 = int_to_ptr.vmem [resolvable:$true] %s20_s16 }
   0x3   :  { %s1783_s18 = smov 8  }
   0x4   :  { %26 = dma.hbm_to_vmem [thread:$0]  %s19_s14, 6528, %s21_s16, [#allocation3], %s1782_s17, %s1782_s17, %s1783_s18  }
   0x5   :  { %1777 = dma.done.wait [#allocation3], 6528  }
   0x6   :  { %1778 = vsyncadd [#allocation3], 4294960768  ;;  %vm71_vm0 = vcmask 261120   ;;  %v1817_v0 = vld [vmem:[%s2208_s0] sm:$0xff]  ;;  %v1822_v1 = vld [vmem:[%s2208_s0 + $0x8] sm:$0xff]  ;;  %v1784_v4 = vmov 32.0  }
   0x7   :  { %v72_v2 = vsel %vm71_vm0, %v1817_v0, 0.0  ;;  %v75_v3 = vsel %vm71_vm0, %v1822_v1, 0.0  ;;  %1613 = vrcp.f32 %v1784_v4  ;;  %v46_v21 = vld [vmem:[#allocation2 + $0x18] sm:$0xff]  ;;  %v45_v22 = vld [vmem:[#allocation2 + $0x10] sm:$0xff]  ;;  %v44_v23 = vld [vmem:[#allocation2 + $0x8] sm:$0xff]  ;;  %s1785_s0 = smov 96  }
   0x8   :  { %73 = vadd.xlane.f32.xlu0 %v72_v2  ;;  %180 = vmatpush.msra.mxu1 %v46_v21  ;;  %v43_v25 = vld [vmem:[#allocation2] sm:$0xff]  ;;  %vm276_vm14 = vcmask 130048   ;;  %s1786_s26 = smov 64   ;;  %s1513_s7 = sshll.u32 %s2211_s3, 4  ;;  %s1514_s7 = int_to_ptr.hbm [resolvable:$true] %s1513_s7 }
   0x9   :  { %v1595_v55 = vld [vmem:[#allocation2 + $0xa4] ss:$0 sm:$0xff]  ;;  %v1596_v63 = vld [vmem:[#allocation2 + $0xa5] ss:$0 sm:$0xff] }
   0xa   :  { %181 = vmatpush.msra.mxu1 %v45_v22 }
   0xc   :  { %182 = vmatpush.msra.mxu1 %v44_v23 }
   0xd   :  { %v1614_v5 = vpop.eup %1613 }
   0xe   :  { %v79_v6 = vmul.f32 32.0, %v1614_v5  ;;  %vm83_vm1 = vweird.f32 %v1614_v5  ;;  %183 = vmatpush.msra.mxu1 %v43_v25 }
  0x10   :  { %76 = vadd.xlane.f32.xlu0 %v75_v3  ;;  %v80_v7 = vsub.f32 1.0, %v79_v6 }
  0x12   :  { %v81_v8 = vmul.f32 %v1614_v5, %v80_v7 }
  0x14   :  { %v82_v9 = vadd.f32 %v1614_v5, %v81_v8 }
  0x16   :  { %v1828_v10 = vsel %vm83_vm1, %v1614_v5, %v82_v9 }
  0x7b   :  { %v74_v11 = vpop.xlane.xlu0 %73 }
  0x7c   :  { %v85_v12 = vmul.f32 %v1828_v10, %v74_v11 }
  0x7e   :  { %v1832_v13 = vsub.f32 %v1817_v0, %v85_v12 }
  0x80   :  { %v89_v14 = vmul.f32 %v1832_v13, %v1832_v13  ;;  %v124_v61 = vmul.f32 %v1595_v55, %v1832_v13 }
  0x82   :  { %v91_v15 = vsel %vm71_vm0, %v89_v14, 0.0 }
  0x83   :  { %92 = vadd.xlane.f32.xlu1 %v91_v15  ;;  %v77_v16 = vpop.xlane.xlu0 %76 }
  0x84   :  { %v86_v17 = vmul.f32 %v1828_v10, %v77_v16 }
  0x86   :  { %v1839_v18 = vsub.f32 %v1822_v1, %v86_v17 }
  0x88   :  { %v90_v19 = vmul.f32 %v1839_v18, %v1839_v18  ;;  %v125_v13 = vmul.f32 %v1595_v55, %v1839_v18 }
  0x8a   :  { %v94_v20 = vsel %vm71_vm0, %v90_v19, 0.0 }
  0x8b   :  { %95 = vadd.xlane.f32.xlu1 %v94_v20  ;;  %v1597_v20 = vld [vmem:[#allocation2 + $0xa0] ss:$0 sm:$0xff] }
  0xf6   :  { %v93_v24 = vpop.xlane.xlu1 %92 }
  0xf7   :  { %v97_v26 = vmul.f32 0.032258064, %v93_v24 }
  0xf9   :  { %1615 = vrsqrt.f32 %v97_v26  ;;  %vm106_vm2 = vcmp.eq.f32.partialorder %v97_v26, inf  ;;  %v109_v39 = vand.u32 2147483648, %v97_v26  ;;  %vm108_vm3 = vcmp.eq.f32.partialorder %v97_v26, 0.0 }
  0xfe   :  { %v96_v27 = vpop.xlane.xlu1 %95 }
  0xff   :  { %v1616_v28 = vpop.eup %1615  ;;  %v98_v29 = vmul.f32 0.032258064, %v96_v27 }
 0x100   :  { %v100_v30 = vmul.f32 %v1616_v28, %v97_v26 }
 0x101   :  { %1617 = vrsqrt.f32 %v98_v29  ;;  %vm118_vm4 = vcmp.eq.f32.partialorder %v98_v29, inf  ;;  %v121_v47 = vand.u32 2147483648, %v98_v29  ;;  %vm120_vm5 = vcmp.eq.f32.partialorder %v98_v29, 0.0 }
 0x102   :  { %v101_v31 = vmul.f32 %v1616_v28, %v100_v30  ;;  %v1866_v30 = vld [vmem:[#allocation2 + $0x160] sm:$0xff] }
 0x104   :  { %v102_v32 = vmul.f32 0.5, %v101_v31 }
 0x106   :  { %v103_v33 = vsub.f32 1.5, %v102_v32  ;;  %v1870_v32 = vld [vmem:[#allocation2 + $0x168] sm:$0xff] }
 0x107   :  { %v1618_v34 = vpop.eup %1617 }
 0x108   :  { %v104_v35 = vmul.f32 %v1616_v28, %v103_v33  ;;  %v112_v36 = vmul.f32 %v1618_v34, %v98_v29 }
 0x10a   :  { %v105_v37 = vmul.f32 %v104_v35, %v97_v26  ;;  %v113_v38 = vmul.f32 %v1618_v34, %v112_v36  ;;  %v1878_v36 = vld [vmem:[#allocation2 + $0x178] sm:$0xff] }
 0x10c   :  { %v114_v40 = vmul.f32 0.5, %v113_v38  ;;  %v107_v41 = vsel %vm106_vm2, %v97_v26, %v105_v37  ;;  %v1860_v26 = vld [vmem:[#allocation2 + $0x158] sm:$0xff]  ;;  %v1882_v38 = vld [vmem:[#allocation2 + $0x180] sm:$0xff] }
 0x10d   :  { %v110_v42 = vsel %vm108_vm3, %v109_v39, %v107_v41 }
 0x10e   :  { %v115_v43 = vsub.f32 1.5, %v114_v40  ;;  %v126_v44 = vadd.f32 1e-06, %v110_v42  ;;  %v1886_v40 = vld [vmem:[#allocation2 + $0x188] sm:$0xff]  ;;  %v1890_v42 = vld [vmem:[#allocation2 + $0x190] sm:$0xff] }
 0x110   :  { %v116_v45 = vmul.f32 %v1618_v34, %v115_v43  ;;  %1619 = vrcp.f32 %v126_v44  ;;  %v139_v54 = vand.u32 2147483648, %v126_v44  ;;  %v137_v57 = vand.u32 2147483647, %v126_v44  ;;  %v1874_v34 = vld [vmem:[#allocation2 + $0x170] sm:$0xff] }
 0x111   :  { %vm133_vm7 = vweird.f32 %v126_v44 }
 0x112   :  { %v117_v46 = vmul.f32 %v116_v45, %v98_v29  ;;  %v140_v60 = vor.u32 1.1754944e-38, %v139_v54  ;;  %vm138_vm9 = vcmp.eq.f32.partialorder %v137_v57, 8.507059e+37 }
 0x114   :  { %v119_v48 = vsel %vm118_vm4, %v98_v29, %v117_v46 }
 0x115   :  { %v122_v49 = vsel %vm120_vm5, %v121_v47, %v119_v48  ;;  %v42_v48 = vld [vmem:[%s2209_s1 + $0x8] sm:$0xff] }
 0x116   :  { %v1620_v50 = vpop.eup %1619  ;;  %v127_v51 = vadd.f32 1e-06, %v122_v49 }
 0x117   :  { %v129_v52 = vmul.f32 %v1620_v50, %v126_v44  ;;  %vm134_vm6 = vweird.f32 %v1620_v50  ;;  %v41_v44 = vld [vmem:[%s2209_s1] sm:$0xff] }
 0x118   :  { %1621 = vrcp.f32 %v127_v51  ;;  %vm135_vm8 = vmor %vm133_vm7, %vm134_vm6  ;;  %v154_v6 = vand.u32 2147483648, %v127_v51  ;;  %v152_v9 = vand.u32 2147483647, %v127_v51  ;;  %vm148_vm11 = vweird.f32 %v127_v51 }
 0x119   :  { %v130_v53 = vsub.f32 1.0, %v129_v52 }
 0x11a   :  { %v155_v12 = vor.u32 1.1754944e-38, %v154_v6  ;;  %vm153_vm13 = vcmp.eq.f32.partialorder %v152_v9, 8.507059e+37 }
 0x11b   :  { %v131_v56 = vmul.f32 %v1620_v50, %v130_v53 }
 0x11d   :  { %v132_v58 = vadd.f32 %v1620_v50, %v131_v56 }
 0x11e   :  { %v1622_v59 = vpop.eup %1621 }
 0x11f   :  { %v136_v62 = vsel %vm135_vm8, %v1620_v50, %v132_v58  ;;  %v144_v2 = vmul.f32 %v1622_v59, %v127_v51  ;;  %vm149_vm10 = vweird.f32 %v1622_v59 }
 0x120   :  { %v141_v3 = vsel %vm138_vm9, %v140_v60, %v136_v62  ;;  %vm150_vm12 = vmor %vm148_vm11, %vm149_vm10 }
 0x121   :  { %v142_v4 = vmul.f32 %v141_v3, %v124_v61  ;;  %v145_v5 = vsub.f32 1.0, %v144_v2 }
 0x123   :  { %v159_v7 = vadd.f32 %v1596_v63, %v142_v4  ;;  %v146_v8 = vmul.f32 %v1622_v59, %v145_v5 }
 0x125   :  { %1526 = vmatmul.msk.f32.vlgmr.msra.gmra.mxu1 %vm71_vm0, %v159_v7  ;;  %v147_v11 = vadd.f32 %v1622_v59, %v146_v8 }
 0x127   :  { %v151_v14 = vsel %vm150_vm12, %v1622_v59, %v147_v11 }
 0x128   :  { %v156_v15 = vsel %vm153_vm13, %v155_v12, %v151_v14 }
 0x129   :  { %v157_v16 = vmul.f32 %v156_v15, %v125_v13 }
 0x12b   :  { %v160_v17 = vadd.f32 %v1596_v63, %v157_v16 }
 0x12d   :  { %1527 = vmatmul.msk.f32.gmra.mxu1 %vm71_vm0, %v160_v17 }
 0x1a2   :  { %v185_v19 = vpop.f32.mrf.mxu1 }
 0x1a3   :  { %v1848_v22 = vadd.f32 %v1597_v20, %v185_v19 }
 0x1a5   :  { %v191_v25 = vmul.f32 0.35355338, %v1848_v22 }
 0x1a7   :  { %v193_v28 = vmul.f32 %v191_v25, %v1860_v26  ;;  %v195_v33 = vmul.f32 %v191_v25, %v1870_v32  ;;  %v197_v37 = vmul.f32 %v191_v25, %v1878_v36  ;;  %v199_v41 = vmul.f32 %v191_v25, %v1886_v40 }
 0x1aa   :  { %v188_v21 = vpop.f32.mrf.mxu1 }
 0x1ab   :  { %v1850_v23 = vadd.f32 %v1597_v20, %v188_v21 }
 0x1ad   :  { %205 = vrot.lane.b32.xlu2 %v1850_v23, %s1785_s0  ;;  %v1585_v18 = vpack.i.bf16 %v1848_v22, %v1850_v23  ;;  %v192_v29 = vmul.f32 0.35355338, %v1850_v23 }
 0x1af   :  { %v194_v31 = vmul.f32 %v192_v29, %v1866_v30  ;;  %v196_v35 = vmul.f32 %v192_v29, %v1874_v34  ;;  %v198_v39 = vmul.f32 %v192_v29, %v1882_v38  ;;  %v200_v43 = vmul.f32 %v192_v29, %v1890_v42 }
 0x1b5   :  { %203 = vrot.lane.b32.xlu2 %v1848_v22, %s1785_s0 }
 0x207   :  { %v206_v24 = vpop.permute.xlu2 %205 }
 0x208   :  { %1528 = vmatpush.xpose.msk.msrb.mxu1 %vm71_vm0, %v206_v24 }
 0x20f   :  { %v204_v27 = vpop.permute.xlu2 %203 }
 0x210   :  { %1529 = vmatpush.xpose.msk.msrb.mxu1 %vm71_vm0, %v204_v27 }
 0x213   :  { %1530 = vmatmul.msk.f32.vlgmr.msrb.gmra.mxu1 %vm71_vm0, %v193_v28 }
 0x21b   :  { %1531 = vmatmul.msk.f32.gmra.mxu1 %vm71_vm0, %v194_v31 }
 0x223   :  { %1532 = vmatmul.msk.f32.gmra.mxu1 %vm71_vm0, %v195_v33 }
 0x22b   :  { %1533 = vmatmul.msk.f32.gmra.mxu1 %vm71_vm0, %v196_v35 }
 0x233   :  { %1534 = vmatmul.msk.f32.gmra.mxu1 %vm71_vm0, %v197_v37 }
 0x23b   :  { %1535 = vmatmul.msk.f32.gmra.mxu1 %vm71_vm0, %v198_v39 }
 0x243   :  { %1536 = vmatmul.msk.f32.gmra.mxu1 %vm71_vm0, %v199_v41 }
 0x24b   :  { %1537 = vmatmul.msk.f32.gmra.mxu1 %vm71_vm0, %v200_v43 }
 0x290   :  { %v252_v45 = vpop.f32.mrf.mxu1 }
 0x291   :  { %v253_v46 = vadd.f32 %v252_v45, %v41_v44 }
 0x293   :  { %v277_v47 = vsel %vm276_vm14, %v253_v46, -inf }
 0x294   :  { %278 = vmax.xlane.f32.xlu0 %v277_v47 }
 0x298   :  { %v255_v49 = vpop.f32.mrf.mxu1 }
 0x299   :  { %v256_v50 = vadd.f32 %v255_v49, %v42_v48 }
 0x29b   :  { %v280_v51 = vsel %vm276_vm14, %v256_v50, -inf }
 0x29c   :  { %281 = vmax.xlane.f32.xlu1 %v280_v51 }
 0x2a0   :  { %v258_v52 = vpop.f32.mrf.mxu1 }
 0x2a1   :  { %v259_v53 = vadd.f32 %v258_v52, %v41_v44 }
 0x2a3   :  { %v283_v54 = vsel %vm276_vm14, %v259_v53, -inf }
 0x2a4   :  { %284 = vmax.xlane.f32.xlu2 %v283_v54 }
 0x2a8   :  { %v261_v55 = vpop.f32.mrf.mxu1 }
 0x2a9   :  { %v262_v56 = vadd.f32 %v261_v55, %v42_v48 }
 0x2ab   :  { %v286_v57 = vsel %vm276_vm14, %v262_v56, -inf }
 0x2ac   :  { %287 = vmax.xlane.f32.xlu0 %v286_v57 }
 0x2b0   :  { %v264_v58 = vpop.f32.mrf.mxu1 }
 0x2b1   :  { %v265_v59 = vadd.f32 %v264_v58, %v41_v44 }
 0x2b3   :  { %v289_v60 = vsel %vm276_vm14, %v265_v59, -inf }
 0x2b4   :  { %290 = vmax.xlane.f32.xlu1 %v289_v60 }
 0x2b8   :  { %v267_v61 = vpop.f32.mrf.mxu1 }
 0x2b9   :  { %v268_v62 = vadd.f32 %v267_v61, %v42_v48 }
 0x2bb   :  { %v292_v63 = vsel %vm276_vm14, %v268_v62, -inf }
 0x2bc   :  { %293 = vmax.xlane.f32.xlu0 %v292_v63 }
 0x2c0   :  { %v270_v2 = vpop.f32.mrf.mxu1 }
 0x2c1   :  { %v271_v3 = vadd.f32 %v270_v2, %v41_v44 }
 0x2c3   :  { %v295_v4 = vsel %vm276_vm14, %v271_v3, -inf }
 0x2c4   :  { %296 = vmax.xlane.f32.xlu1 %v295_v4 }
 0x2c8   :  { %v273_v5 = vpop.f32.mrf.mxu1 }
 0x2c9   :  { %v274_v6 = vadd.f32 %v273_v5, %v42_v48 }
 0x2cb   :  { %v298_v7 = vsel %vm276_vm14, %v274_v6, -inf }
 0x2cc   :  { %299 = vmax.xlane.f32.xlu1 %v298_v7 }
 0x307   :  { %v279_v8 = vpop.xlane.xlu0 %278 }
 0x308   :  { %v301_v9 = vsub.f32 %v253_v46, %v279_v8 }
 0x30a   :  { %v309_v11 = vmul.f32 1.442695, %v301_v9 }
 0x30c   :  { %1623 = vpow2.f32 %v309_v11 }
 0x30f   :  { %v282_v12 = vpop.xlane.xlu1 %281 }
 0x310   :  { %v302_v13 = vsub.f32 %v256_v50, %v282_v12 }
 0x312   :  { %v1908_v14 = vpop.eup %1623  ;;  %v311_v15 = vmul.f32 1.442695, %v302_v13 }
 0x313   :  { %v325_v16 = vsel %vm276_vm14, %v1908_v14, 0.0 }
 0x314   :  { %1625 = vpow2.f32 %v311_v15  ;;  %326 = vadd.xlane.f32.xlu0 %v325_v16 }
 0x317   :  { %v285_v17 = vpop.xlane.xlu2 %284 }
 0x318   :  { %v303_v19 = vsub.f32 %v259_v53, %v285_v17 }
 0x31a   :  { %v1912_v20 = vpop.eup %1625  ;;  %v313_v21 = vmul.f32 1.442695, %v303_v19 }
 0x31b   :  { %v328_v24 = vsel %vm276_vm14, %v1912_v20, 0.0 }
 0x31c   :  { %1627 = vpow2.f32 %v313_v21  ;;  %329 = vadd.xlane.f32.xlu0 %v328_v24 }
 0x31f   :  { %v288_v25 = vpop.xlane.xlu0 %287 }
 0x320   :  { %v304_v27 = vsub.f32 %v262_v56, %v288_v25 }
 0x322   :  { %v1916_v28 = vpop.eup %1627  ;;  %v315_v29 = vmul.f32 1.442695, %v304_v27 }
 0x323   :  { %v331_v31 = vsel %vm276_vm14, %v1916_v28, 0.0 }
 0x324   :  { %1629 = vpow2.f32 %v315_v29  ;;  %332 = vadd.xlane.f32.xlu1 %v331_v31 }
 0x327   :  { %v291_v33 = vpop.xlane.xlu1 %290 }
 0x328   :  { %v305_v35 = vsub.f32 %v265_v59, %v291_v33 }
 0x32a   :  { %v1920_v37 = vpop.eup %1629  ;;  %v317_v39 = vmul.f32 1.442695, %v305_v35 }
 0x32b   :  { %v334_v41 = vsel %vm276_vm14, %v1920_v37, 0.0 }
 0x32c   :  { %1631 = vpow2.f32 %v317_v39  ;;  %335 = vadd.xlane.f32.xlu1 %v334_v41 }
 0x32f   :  { %v294_v43 = vpop.xlane.xlu0 %293 }
 0x330   :  { %v306_v44 = vsub.f32 %v268_v62, %v294_v43  ;;  %1586 = vrot.lane.b32.xlu0 %v1585_v18, %s1786_s26 }
 0x332   :  { %v1928_v45 = vpop.eup %1631  ;;  %v319_v46 = vmul.f32 1.442695, %v306_v44 }
 0x333   :  { %v337_v47 = vsel %vm276_vm14, %v1928_v45, 0.0 }
 0x334   :  { %1633 = vpow2.f32 %v319_v46  ;;  %338 = vadd.xlane.f32.xlu2 %v337_v47 }
 0x337   :  { %v297_v48 = vpop.xlane.xlu1 %296 }
 0x338   :  { %v307_v49 = vsub.f32 %v271_v3, %v297_v48 }
 0x33a   :  { %v1932_v50 = vpop.eup %1633  ;;  %v321_v51 = vmul.f32 1.442695, %v307_v49 }
 0x33b   :  { %v340_v52 = vsel %vm276_vm14, %v1932_v50, 0.0 }
 0x33c   :  { %1635 = vpow2.f32 %v321_v51  ;;  %341 = vadd.xlane.f32.xlu1 %v340_v52 }
 0x33f   :  { %v300_v22 = vpop.xlane.xlu1 %299 }
 0x340   :  { %v308_v23 = vsub.f32 %v274_v6, %v300_v22 }
 0x342   :  { %v1936_v18 = vpop.eup %1635  ;;  %v323_v53 = vmul.f32 1.442695, %v308_v23 }
 0x343   :  { %v343_v54 = vsel %vm276_vm14, %v1936_v18, 0.0 }
 0x344   :  { %1637 = vpow2.f32 %v323_v53  ;;  %344 = vadd.xlane.f32.xlu2 %v343_v54 }
 0x34a   :  { %v1940_v55 = vpop.eup %1637 }
 0x34b   :  { %v346_v56 = vsel %vm276_vm14, %v1940_v55, 0.0 }
 0x34c   :  { %347 = vadd.xlane.f32.xlu1 %v346_v56 }
 0x387   :  { %v327_v57 = vpop.xlane.xlu0 %326 }
 0x388   :  { %1639 = vrcp.f32 %v327_v57  ;;  %v360_v6 = vand.u32 2147483648, %v327_v57  ;;  %vm354_vm1 = vweird.f32 %v327_v57  ;;  %v358_v8 = vand.u32 2147483647, %v327_v57 }
 0x38a   :  { %v361_v15 = vor.u32 1.1754944e-38, %v360_v6  ;;  %vm359_vm3 = vcmp.eq.f32.partialorder %v358_v8, 8.507059e+37 }
 0x38e   :  { %v1640_v58 = vpop.eup %1639 }
 0x38f   :  { %v330_v59 = vpop.xlane.xlu0 %329  ;;  %v350_v60 = vmul.f32 %v1640_v58, %v327_v57  ;;  %vm355_vm15 = vweird.f32 %v1640_v58 }
 0x390   :  { %1641 = vrcp.f32 %v330_v59  ;;  %vm356_vm2 = vmor %vm354_vm1, %vm355_vm15  ;;  %v375_v25 = vand.u32 2147483648, %v330_v59  ;;  %vm369_vm5 = vweird.f32 %v330_v59  ;;  %v373_v33 = vand.u32 2147483647, %v330_v59 }
 0x391   :  { %v351_v61 = vsub.f32 1.0, %v350_v60 }
 0x392   :  { %v376_v44 = vor.u32 1.1754944e-38, %v375_v25  ;;  %vm374_vm7 = vcmp.eq.f32.partialorder %v373_v33, 8.507059e+37 }
 0x393   :  { %v352_v2 = vmul.f32 %v1640_v58, %v351_v61 }
 0x395   :  { %v353_v5 = vadd.f32 %v1640_v58, %v352_v2 }
 0x396   :  { %v1642_v62 = vpop.eup %1641 }
 0x397   :  { %v333_v63 = vpop.xlane.xlu1 %332  ;;  %v365_v3 = vmul.f32 %v1642_v62, %v330_v59  ;;  %v357_v13 = vsel %vm356_vm2, %v1640_v58, %v353_v5  ;;  %vm370_vm4 = vweird.f32 %v1642_v62 }
 0x398   :  { %1643 = vrcp.f32 %v333_v63  ;;  %v362_v19 = vsel %vm359_vm3, %v361_v15, %v357_v13  ;;  %vm371_vm6 = vmor %vm369_vm5, %vm370_vm4  ;;  %v390_v49 = vand.u32 2147483648, %v333_v63  ;;  %vm384_vm9 = vweird.f32 %v333_v63 }
 0x399   :  { %v366_v4 = vsub.f32 1.0, %v365_v3  ;;  %v363_v31 = vmul.f32 %v1908_v14, %v362_v19  ;;  %v388_v52 = vand.u32 2147483647, %v333_v63 }
 0x39a   :  { %v391_v56 = vor.u32 1.1754944e-38, %v390_v49 }
 0x39b   :  { %v367_v11 = vmul.f32 %v1642_v62, %v366_v4  ;;  %vm389_vm11 = vcmp.eq.f32.partialorder %v388_v52, 8.507059e+37 }
 0x39d   :  { %v368_v24 = vadd.f32 %v1642_v62, %v367_v11 }
 0x39e   :  { %v1644_v7 = vpop.eup %1643 }
 0x39f   :  { %v1944_v9 = vpop.xlane.xlu1 %335  ;;  %v380_v12 = vmul.f32 %v1644_v7, %v333_v63  ;;  %v372_v43 = vsel %vm371_vm6, %v1642_v62, %v368_v24  ;;  %vm385_vm8 = vweird.f32 %v1644_v7 }
 0x3a0   :  { %1645 = vrcp.f32 %v1944_v9  ;;  %v377_v46 = vsel %vm374_vm7, %v376_v44, %v372_v43  ;;  %vm386_vm10 = vmor %vm384_vm9, %vm385_vm8  ;;  %v405_v60 = vand.u32 2147483648, %v1944_v9  ;;  %vm399_vm13 = vweird.f32 %v1944_v9 }
 0x3a1   :  { %v381_v21 = vsub.f32 1.0, %v380_v12  ;;  %v378_v14 = vmul.f32 %v1912_v20, %v377_v46  ;;  %v403_v62 = vand.u32 2147483647, %v1944_v9 }
 0x3a2   :  { %v1587_v16 = vpop.permute.xlu0 %1586  ;;  %v406_v5 = vor.u32 1.1754944e-38, %v405_v60 }
 0x3a3   :  { %v1588_v17 = vunpack.i.l.bf16 %v1587_v16  ;;  %v1589_v27 = vunpack.i.h.bf16 %v1587_v16  ;;  %v382_v39 = vmul.f32 %v1644_v7, %v381_v21  ;;  %vm404_vm1 = vcmp.eq.f32.partialorder %v403_v62, 8.507059e+37  ;;  %v49_v62 = vld [vmem:[#allocation2 + $0x30] sm:$0xff] }
 0x3a5   :  { %513 = vmatpush.msra.mxu2 %v1588_v17  ;;  %v383_v48 = vadd.f32 %v1644_v7, %v382_v39 }
 0x3a6   :  { %v1646_v29 = vpop.eup %1645 }
 0x3a7   :  { %514 = vmatpush.msra.mxu2 %v1589_v27  ;;  %v339_v35 = vpop.xlane.xlu2 %338  ;;  %v395_v41 = vmul.f32 %v1646_v29, %v1944_v9  ;;  %v387_v54 = vsel %vm386_vm10, %v1644_v7, %v383_v48  ;;  %vm400_vm12 = vweird.f32 %v1646_v29 }
 0x3a8   :  { %1647 = vrcp.f32 %v339_v35  ;;  %1538 = vmatmul.msk.f32.vlgmr.msra.gmra.mxu2 %vm276_vm14, %v363_v31  ;;  %v392_v57 = vsel %vm389_vm11, %v391_v56, %v387_v54  ;;  %vm401_vm15 = vmor %vm399_vm13, %vm400_vm12  ;;  %v420_v11 = vand.u32 2147483648, %v339_v35  ;;  %vm414_vm3 = vweird.f32 %v339_v35 }
 0x3a9   :  { %v396_v47 = vsub.f32 1.0, %v395_v41  ;;  %v393_v20 = vmul.f32 %v1916_v28, %v392_v57  ;;  %v418_v9 = vand.u32 2147483647, %v339_v35 }
 0x3aa   :  { %v421_v19 = vor.u32 1.1754944e-38, %v420_v11 }
 0x3ab   :  { %v397_v23 = vmul.f32 %v1646_v29, %v396_v47  ;;  %vm419_vm5 = vcmp.eq.f32.partialorder %v418_v9, 8.507059e+37 }
 0x3ad   :  { %v398_v59 = vadd.f32 %v1646_v29, %v397_v23 }
 0x3ae   :  { %v1648_v51 = vpop.eup %1647 }
 0x3af   :  { %v342_v22 = vpop.xlane.xlu1 %341  ;;  %v410_v53 = vmul.f32 %v1648_v51, %v339_v35  ;;  %v402_v4 = vsel %vm401_vm15, %v1646_v29, %v398_v59  ;;  %vm415_vm2 = vweird.f32 %v1648_v51 }
 0x3b0   :  { %1649 = vrcp.f32 %v342_v22  ;;  %1539 = vmatmul.msk.f32.gmra.mxu2 %vm276_vm14, %v378_v14  ;;  %v407_v6 = vsel %vm404_vm1, %v406_v5, %v402_v4  ;;  %vm416_vm4 = vmor %vm414_vm3, %vm415_vm2  ;;  %v435_v27 = vand.u32 2147483648, %v342_v22  ;;  %vm429_vm7 = vweird.f32 %v342_v22 }
 0x3b1   :  { %v411_v58 = vsub.f32 1.0, %v410_v53  ;;  %v408_v28 = vmul.f32 %v1920_v37, %v407_v6  ;;  %v433_v31 = vand.u32 2147483647, %v342_v22 }
 0x3b2   :  { %v436_v41 = vor.u32 1.1754944e-38, %v435_v27 }
 0x3b3   :  { %v412_v2 = vmul.f32 %v1648_v51, %v411_v58  ;;  %vm434_vm9 = vcmp.eq.f32.partialorder %v433_v31, 8.507059e+37 }
 0x3b5   :  { %v413_v8 = vadd.f32 %v1648_v51, %v412_v2 }
 0x3b6   :  { %v1650_v61 = vpop.eup %1649 }
 0x3b7   :  { %v345_v63 = vpop.xlane.xlu2 %344  ;;  %v425_v3 = vmul.f32 %v1650_v61, %v342_v22  ;;  %v417_v17 = vsel %vm416_vm4, %v1648_v51, %v413_v8  ;;  %vm430_vm6 = vweird.f32 %v1650_v61 }
 0x3b8   :  { %1651 = vrcp.f32 %v345_v63  ;;  %1540 = vmatmul.msk.f32.gmra.mxu2 %vm276_vm14, %v393_v20  ;;  %v422_v21 = vsel %vm419_vm5, %v421_v19, %v417_v17  ;;  %vm431_vm8 = vmor %vm429_vm7, %vm430_vm6  ;;  %v450_v47 = vand.u32 2147483648, %v345_v63  ;;  %vm444_vm11 = vweird.f32 %v345_v63  ;;  %v1598_v19 = vld [vmem:[#allocation2 + $0xa1] ss:$0 sm:$0xff] }
 0x3b9   :  { %v426_v7 = vsub.f32 1.0, %v425_v3  ;;  %v423_v37 = vmul.f32 %v1928_v45, %v422_v21  ;;  %v448_v49 = vand.u32 2147483647, %v345_v63 }
 0x3ba   :  { %v451_v14 = vor.u32 1.1754944e-38, %v450_v47 }
 0x3bb   :  { %v427_v15 = vmul.f32 %v1650_v61, %v426_v7  ;;  %vm449_vm13 = vcmp.eq.f32.partialorder %v448_v49, 8.507059e+37 }
 0x3bd   :  { %v428_v25 = vadd.f32 %v1650_v61, %v427_v15 }
 0x3be   :  { %v1652_v12 = vpop.eup %1651 }
 0x3bf   :  { %v348_v13 = vpop.xlane.xlu1 %347  ;;  %v440_v16 = vmul.f32 %v1652_v12, %v345_v63  ;;  %v432_v39 = vsel %vm431_vm8, %v1650_v61, %v428_v25  ;;  %vm445_vm10 = vweird.f32 %v1652_v12  ;;  %v50_v61 = vld [vmem:[#allocation2 + $0x38] sm:$0xff]  ;;  %v47_v63 = vld [vmem:[#allocation2 + $0x20] sm:$0xff] }
 0x3c0   :  { %1653 = vrcp.f32 %v348_v13  ;;  %1541 = vmatmul.msk.f32.gmra.mxu2 %vm276_vm14, %v408_v28  ;;  %v437_v43 = vsel %vm434_vm9, %v436_v41, %v432_v39  ;;  %vm446_vm12 = vmor %vm444_vm11, %vm445_vm10  ;;  %v465_v23 = vand.u32 2147483648, %v348_v13  ;;  %vm459_vm1 = vweird.f32 %v348_v13  ;;  %572 = vmatpush.msra.mxu3 %v50_v61 }
 0x3c1   :  { %v441_v24 = vsub.f32 1.0, %v440_v16  ;;  %v438_v48 = vmul.f32 %v1932_v50, %v437_v43  ;;  %v463_v54 = vand.u32 2147483647, %v348_v13  ;;  %v54_v43 = vld [vmem:[#allocation2 + $0x58] sm:$0xff] }
 0x3c2   :  { %v466_v56 = vor.u32 1.1754944e-38, %v465_v23  ;;  %573 = vmatpush.msra.mxu3 %v49_v62  ;;  %689 = vmatpush.msra.mxu0 %v54_v43  ;;  %v62_v62 = vld [vmem:[#allocation2 + $0x98] sm:$0xff] }
 0x3c3   :  { %v442_v33 = vmul.f32 %v1652_v12, %v441_v24  ;;  %vm464_vm3 = vcmp.eq.f32.partialorder %v463_v54, 8.507059e+37 }
 0x3c5   :  { %v443_v46 = vadd.f32 %v1652_v12, %v442_v33 }
 0x3c6   :  { %v1654_v29 = vpop.eup %1653 }
 0x3c7   :  { %v455_v35 = vmul.f32 %v1654_v29, %v348_v13  ;;  %v447_v51 = vsel %vm446_vm12, %v1652_v12, %v443_v46  ;;  %vm460_vm15 = vweird.f32 %v1654_v29  ;;  %v52_v46 = vld [vmem:[#allocation2 + $0x48] sm:$0xff] }
 0x3c8   :  { %1542 = vmatmul.msk.f32.gmra.mxu2 %vm276_vm14, %v423_v37  ;;  %v452_v52 = vsel %vm449_vm13, %v451_v14, %v447_v51  ;;  %vm461_vm2 = vmor %vm459_vm1, %vm460_vm15 }
 0x3c9   :  { %v456_v44 = vsub.f32 1.0, %v455_v35  ;;  %v453_v53 = vmul.f32 %v1936_v18, %v452_v52  ;;  %v48_v18 = vld [vmem:[#allocation2 + $0x28] sm:$0xff] }
 0x3ca   :  { %574 = vmatpush.msra.mxu3 %v48_v18  ;;  %v61_v18 = vld [vmem:[#allocation2 + $0x90] sm:$0xff] }
 0x3cb   :  { %v457_v45 = vmul.f32 %v1654_v29, %v456_v44  ;;  %v53_v44 = vld [vmem:[#allocation2 + $0x50] sm:$0xff] }
 0x3cc   :  { %575 = vmatpush.msra.mxu3 %v47_v63  ;;  %690 = vmatpush.msra.mxu0 %v53_v44 }
 0x3cd   :  { %v458_v22 = vadd.f32 %v1654_v29, %v457_v45 }
 0x3ce   :  { %691 = vmatpush.msra.mxu0 %v52_v46  ;;  %717 = vmatpush.msrb.mxu3 %v62_v62 }
 0x3cf   :  { %v462_v50 = vsel %vm461_vm2, %v1654_v29, %v458_v22  ;;  %vm702_vm2 = vcmask 523264  }
 0x3d0   :  { %1543 = vmatmul.msk.f32.gmra.mxu2 %vm276_vm14, %v438_v48  ;;  %v467_v57 = vsel %vm464_vm3, %v466_v56, %v462_v50  ;;  %v51_v48 = vld [vmem:[#allocation2 + $0x40] sm:$0xff]  ;;  %718 = vmatpush.msrb.mxu3 %v61_v18 }
 0x3d1   :  { %v468_v58 = vmul.f32 %v1940_v55, %v467_v57  ;;  %692 = vmatpush.msra.mxu0 %v51_v48  ;;  %v56_v48 = vld [vmem:[#allocation2 + $0x68] sm:$0xff] }
 0x3d8   :  { %1544 = vmatmul.msk.f32.gmra.mxu2 %vm276_vm14, %v453_v53 }
 0x3e0   :  { %1545 = vmatmul.msk.f32.gmra.mxu2 %vm276_vm14, %v468_v58 }
 0x42b   :  { %v516_v59 = vpop.f32.mrf.mxu2 }
 0x42c   :  { %v540_v55 = vmul.f32 %v516_v59, %v1860_v26 }
 0x433   :  { %v519_v60 = vpop.f32.mrf.mxu2 }
 0x434   :  { %v541_v13 = vmul.f32 %v519_v60, %v1866_v30 }
 0x43b   :  { %v522_v20 = vpop.f32.mrf.mxu2 }
 0x43c   :  { %v542_v5 = vmul.f32 %v522_v20, %v1870_v32 }
 0x43e   :  { %v548_v7 = vadd.f32 %v542_v5, %v540_v55  ;;  %v59_v5 = vld [vmem:[#allocation2 + $0x80] sm:$0xff] }
 0x443   :  { %v525_v2 = vpop.f32.mrf.mxu2 }
 0x444   :  { %v543_v28 = vmul.f32 %v525_v2, %v1874_v34 }
 0x446   :  { %v549_v16 = vadd.f32 %v543_v28, %v541_v13 }
 0x44b   :  { %v528_v3 = vpop.f32.mrf.mxu2 }
 0x44c   :  { %v544_v6 = vmul.f32 %v528_v3, %v1878_v36  ;;  %v60_v3 = vld [vmem:[#allocation2 + $0x88] sm:$0xff] }
 0x44d   :  { %719 = vmatpush.msrb.mxu3 %v60_v3 }
 0x44e   :  { %v550_v11 = vadd.f32 %v548_v7, %v544_v6  ;;  %v58_v7 = vld [vmem:[#allocation2 + $0x78] sm:$0xff] }
 0x44f   :  { %720 = vmatpush.msrb.mxu3 %v59_v5 }
 0x451   :  { %721 = vmatpush.msrb.mxu3 %v58_v7  ;;  %v738_v7 = vld [vmem:[#allocation2 + $0xb0] sm:$0xff] }
 0x453   :  { %v531_v4 = vpop.f32.mrf.mxu2 }
 0x454   :  { %v545_v15 = vmul.f32 %v531_v4, %v1882_v38 }
 0x456   :  { %v551_v17 = vadd.f32 %v549_v16, %v545_v15  ;;  %v1599_v16 = vld [vmem:[#allocation2 + $0xa6] ss:$0 sm:$0xff] }
 0x45b   :  { %v534_v8 = vpop.f32.mrf.mxu2 }
 0x45c   :  { %v546_v12 = vmul.f32 %v534_v8, %v1886_v40 }
 0x45e   :  { %v552_v9 = vadd.f32 %v550_v11, %v546_v12 }
 0x460   :  { %1546 = vmatmul.msk.f32.vlgmr.msra.gmra.mxu3 %vm71_vm0, %v552_v9 }
 0x463   :  { %v537_v32 = vpop.f32.mrf.mxu2 }
 0x464   :  { %v547_v26 = vmul.f32 %v537_v32, %v1890_v42 }
 0x466   :  { %v553_v36 = vadd.f32 %v551_v17, %v547_v26 }
 0x468   :  { %1547 = vmatmul.msk.f32.gmra.mxu3 %vm71_vm0, %v553_v36 }
 0x4e3   :  { %v577_v21 = vpop.f32.mrf.mxu3 }
 0x4e4   :  { %v583_v40 = vadd.f32 %v577_v21, %v1817_v0 }
 0x4e6   :  { %v1978_v34 = vadd.f32 %v1598_v19, %v583_v40 }
 0x4e8   :  { %v588_v30 = vsel %vm71_vm0, %v1978_v34, 0.0 }
 0x4e9   :  { %589 = vadd.xlane.f32.xlu2 %v588_v30  ;;  %v1600_v30 = vld [vmem:[#allocation2 + $0xa7] ss:$0 sm:$0xff] }
 0x4eb   :  { %v580_v38 = vpop.f32.mrf.mxu3 }
 0x4ec   :  { %v584_v24 = vadd.f32 %v580_v38, %v1822_v1 }
 0x4ee   :  { %v1983_v25 = vadd.f32 %v1598_v19, %v584_v24 }
 0x4f0   :  { %v591_v42 = vsel %vm71_vm0, %v1983_v25, 0.0 }
 0x4f1   :  { %592 = vadd.xlane.f32.xlu0 %v591_v42 }
 0x55c   :  { %v590_v27 = vpop.xlane.xlu2 %589 }
 0x55d   :  { %v594_v29 = vmul.f32 %v590_v27, %v1828_v10 }
 0x55f   :  { %v1989_v0 = vsub.f32 %v1978_v34, %v594_v29 }
 0x561   :  { %v598_v37 = vmul.f32 %v1989_v0, %v1989_v0  ;;  %v633_v21 = vmul.f32 %v1599_v16, %v1989_v0 }
 0x563   :  { %v600_v31 = vsel %vm71_vm0, %v598_v37, 0.0 }
 0x564   :  { %601 = vadd.xlane.f32.xlu1 %v600_v31  ;;  %v593_v33 = vpop.xlane.xlu0 %592 }
 0x565   :  { %v595_v1 = vmul.f32 %v593_v33, %v1828_v10 }
 0x567   :  { %v1996_v35 = vsub.f32 %v1983_v25, %v595_v1 }
 0x569   :  { %v599_v39 = vmul.f32 %v1996_v35, %v1996_v35  ;;  %v634_v0 = vmul.f32 %v1599_v16, %v1996_v35 }
 0x56b   :  { %v603_v41 = vsel %vm71_vm0, %v599_v39, 0.0 }
 0x56c   :  { %604 = vadd.xlane.f32.xlu2 %v603_v41 }
 0x5d7   :  { %v602_v47 = vpop.xlane.xlu1 %601 }
 0x5d8   :  { %v606_v49 = vmul.f32 0.032258064, %v602_v47  ;;  %v57_v47 = vld [vmem:[#allocation2 + $0x70] sm:$0xff] }
 0x5d9   :  { %722 = vmatpush.msrb.mxu3 %v57_v47  ;;  %v1603_v47 = vld [vmem:[#allocation2 + $0x14c] ss:$0 sm:$0xff] }
 0x5da   :  { %1655 = vrsqrt.f32 %v606_v49  ;;  %vm615_vm4 = vcmp.eq.f32.partialorder %v606_v49, inf  ;;  %v618_v59 = vand.u32 2147483648, %v606_v49  ;;  %vm617_vm5 = vcmp.eq.f32.partialorder %v606_v49, 0.0 }
 0x5db   :  { %723 = vmatpush.msrb.mxu3 %v56_v48 }
 0x5df   :  { %v605_v45 = vpop.xlane.xlu2 %604 }
 0x5e0   :  { %v1656_v51 = vpop.eup %1655  ;;  %v607_v14 = vmul.f32 0.032258064, %v605_v45  ;;  %v1601_v45 = vld [vmem:[#allocation2 + $0xa2] ss:$0 sm:$0xff] }
 0x5e1   :  { %v609_v52 = vmul.f32 %v1656_v51, %v606_v49 }
 0x5e2   :  { %1657 = vrsqrt.f32 %v607_v14  ;;  %vm627_vm6 = vcmp.eq.f32.partialorder %v607_v14, inf  ;;  %v630_v6 = vand.u32 2147483648, %v607_v14  ;;  %vm629_vm7 = vcmp.eq.f32.partialorder %v607_v14, 0.0 }
 0x5e3   :  { %v610_v22 = vmul.f32 %v1656_v51, %v609_v52 }
 0x5e5   :  { %v611_v23 = vmul.f32 0.5, %v610_v22 }
 0x5e7   :  { %v612_v53 = vsub.f32 1.5, %v611_v23 }
 0x5e8   :  { %v1658_v54 = vpop.eup %1657 }
 0x5e9   :  { %v613_v50 = vmul.f32 %v1656_v51, %v612_v53  ;;  %v621_v56 = vmul.f32 %v1658_v54, %v607_v14  ;;  %v1602_v53 = vld [vmem:[#allocation2 + $0xa3] ss:$0 sm:$0xff] }
 0x5eb   :  { %v614_v57 = vmul.f32 %v613_v50, %v606_v49  ;;  %v622_v58 = vmul.f32 %v1658_v54, %v621_v56 }
 0x5ed   :  { %v623_v60 = vmul.f32 0.5, %v622_v58  ;;  %v616_v61 = vsel %vm615_vm4, %v606_v49, %v614_v57  ;;  %v55_v49 = vld [vmem:[#allocation2 + $0x60] sm:$0xff] }
 0x5ee   :  { %v619_v20 = vsel %vm617_vm5, %v618_v59, %v616_v61  ;;  %724 = vmatpush.msrb.mxu3 %v55_v49 }
 0x5ef   :  { %v624_v63 = vsub.f32 1.5, %v623_v60  ;;  %v635_v2 = vadd.f32 1e-06, %v619_v20 }
 0x5f1   :  { %v625_v4 = vmul.f32 %v1658_v54, %v624_v63  ;;  %1659 = vrcp.f32 %v635_v2  ;;  %v648_v15 = vand.u32 2147483648, %v635_v2  ;;  %v646_v17 = vand.u32 2147483647, %v635_v2 }
 0x5f2   :  { %vm642_vm9 = vweird.f32 %v635_v2 }
 0x5f3   :  { %v626_v55 = vmul.f32 %v625_v4, %v607_v14  ;;  %v649_v19 = vor.u32 1.1754944e-38, %v648_v15  ;;  %vm647_vm11 = vcmp.eq.f32.partialorder %v646_v17, 8.507059e+37 }
 0x5f5   :  { %v628_v8 = vsel %vm627_vm6, %v607_v14, %v626_v55  ;;  %v740_v55 = vld [vmem:[#allocation2 + $0xc0] sm:$0xff] }
 0x5f6   :  { %v631_v11 = vsel %vm629_vm7, %v630_v6, %v628_v8  ;;  %v739_v6 = vld [vmem:[#allocation2 + $0xb8] sm:$0xff]  ;;  %866 = vmatpush.msrb.mxu0 %v740_v55 }
 0x5f7   :  { %v1660_v12 = vpop.eup %1659  ;;  %v636_v28 = vadd.f32 1e-06, %v631_v11  ;;  %v737_v11 = vld [vmem:[#allocation2 + $0xa8] sm:$0xff] }
 0x5f8   :  { %v638_v9 = vmul.f32 %v1660_v12, %v635_v2  ;;  %vm643_vm8 = vweird.f32 %v1660_v12  ;;  %867 = vmatpush.msrb.mxu0 %v739_v6 }
 0x5f9   :  { %1661 = vrcp.f32 %v636_v28  ;;  %vm644_vm10 = vmor %vm642_vm9, %vm643_vm8  ;;  %v663_v29 = vand.u32 2147483648, %v636_v28  ;;  %v661_v33 = vand.u32 2147483647, %v636_v28  ;;  %vm657_vm13 = vweird.f32 %v636_v28 }
 0x5fa   :  { %v639_v13 = vsub.f32 1.0, %v638_v9  ;;  %868 = vmatpush.msrb.mxu0 %v738_v7 }
 0x5fb   :  { %v664_v39 = vor.u32 1.1754944e-38, %v663_v29  ;;  %vm662_vm1 = vcmp.eq.f32.partialorder %v661_v33, 8.507059e+37 }
 0x5fc   :  { %v640_v32 = vmul.f32 %v1660_v12, %v639_v13  ;;  %869 = vmatpush.msrb.mxu0 %v737_v11 }
 0x5fe   :  { %v641_v26 = vadd.f32 %v1660_v12, %v640_v32 }
 0x5ff   :  { %v1662_v36 = vpop.eup %1661 }
 0x600   :  { %v645_v40 = vsel %vm644_vm10, %v1660_v12, %v641_v26  ;;  %v653_v38 = vmul.f32 %v1662_v36, %v636_v28  ;;  %vm658_vm12 = vweird.f32 %v1662_v36 }
 0x601   :  { %v650_v24 = vsel %vm647_vm11, %v649_v19, %v645_v40  ;;  %vm659_vm15 = vmor %vm657_vm13, %vm658_vm12 }
 0x602   :  { %v651_v42 = vmul.f32 %v650_v24, %v633_v21  ;;  %v654_v27 = vsub.f32 1.0, %v653_v38 }
 0x604   :  { %v668_v37 = vadd.f32 %v1600_v30, %v651_v42  ;;  %v655_v31 = vmul.f32 %v1662_v36, %v654_v27 }
 0x606   :  { %1548 = vmatmul.msk.f32.vlgmr.msra.gmra.mxu0 %vm71_vm0, %v668_v37  ;;  %v656_v1 = vadd.f32 %v1662_v36, %v655_v31 }
 0x608   :  { %v660_v41 = vsel %vm659_vm15, %v1662_v36, %v656_v1 }
 0x609   :  { %v665_v43 = vsel %vm662_vm1, %v664_v39, %v660_v41 }
 0x60a   :  { %v666_v44 = vmul.f32 %v665_v43, %v634_v0 }
 0x60c   :  { %v669_v46 = vadd.f32 %v1600_v30, %v666_v44 }
 0x60e   :  { %1549 = vmatmul.msk.f32.gmra.mxu0 %vm71_vm0, %v669_v46 }
 0x683   :  { %v694_v51 = vpop.f32.mrf.mxu0 }
 0x684   :  { %v695_v14 = vadd.f32 %v1601_v45, %v694_v51 }
 0x686   :  { %v700_v52 = vmax.f32 %v695_v14, 0.0 }
 0x688   :  { %1550 = vmatmul.msk.f32.vlgmr.msrb.gmra.mxu3 %vm702_vm2, %v700_v52 }
 0x68b   :  { %v697_v35 = vpop.f32.mrf.mxu0 }
 0x68c   :  { %v698_v22 = vadd.f32 %v1601_v45, %v697_v35 }
 0x68e   :  { %v701_v23 = vmax.f32 %v698_v22, 0.0  ;;  %v1604_v22 = vld [vmem:[#allocation2 + $0x14d] ss:$0 sm:$0xff] }
 0x690   :  { %1551 = vmatmul.msk.f32.gmra.mxu3 %vm702_vm2, %v701_v23 }
 0x70b   :  { %v726_v54 = vpop.f32.mrf.mxu3 }
 0x70c   :  { %v732_v50 = vadd.f32 %v726_v54, %v1978_v34 }
 0x70e   :  { %v2008_v56 = vadd.f32 %v1602_v53, %v732_v50 }
 0x710   :  { %v765_v57 = vsel %vm71_vm0, %v2008_v56, 0.0 }
 0x711   :  { %766 = vadd.xlane.f32.xlu1 %v765_v57 }
 0x713   :  { %v729_v58 = vpop.f32.mrf.mxu3 }
 0x714   :  { %v733_v59 = vadd.f32 %v729_v58, %v1983_v25 }
 0x716   :  { %v2013_v60 = vadd.f32 %v1602_v53, %v733_v59 }
 0x718   :  { %v768_v61 = vsel %vm71_vm0, %v2013_v60, 0.0 }
 0x719   :  { %769 = vadd.xlane.f32.xlu2 %v768_v61 }
 0x784   :  { %v767_v20 = vpop.xlane.xlu1 %766 }
 0x785   :  { %v771_v62 = vmul.f32 %v767_v20, %v1828_v10 }
 0x787   :  { %v2019_v34 = vsub.f32 %v2008_v56, %v771_v62 }
 0x789   :  { %v775_v18 = vmul.f32 %v2019_v34, %v2019_v34  ;;  %v810_v52 = vmul.f32 %v1603_v47, %v2019_v34 }
 0x78b   :  { %v777_v63 = vsel %vm71_vm0, %v775_v18, 0.0 }
 0x78c   :  { %778 = vadd.xlane.f32.xlu1 %v777_v63  ;;  %v770_v2 = vpop.xlane.xlu2 %769 }
 0x78d   :  { %v772_v25 = vmul.f32 %v770_v2, %v1828_v10 }
 0x78f   :  { %v2026_v3 = vsub.f32 %v2013_v60, %v772_v25 }
 0x791   :  { %v776_v4 = vmul.f32 %v2026_v3, %v2026_v3  ;;  %v811_v34 = vmul.f32 %v1603_v47, %v2026_v3 }
 0x793   :  { %v780_v5 = vsel %vm71_vm0, %v776_v4, 0.0  ;;  %v1605_v4 = vld [vmem:[#allocation2 + $0x148] ss:$0 sm:$0xff] }
 0x794   :  { %781 = vadd.xlane.f32.xlu2 %v780_v5 }
 0x7ff   :  { %v779_v8 = vpop.xlane.xlu1 %778 }
 0x800   :  { %v783_v12 = vmul.f32 0.032258064, %v779_v8 }
 0x802   :  { %1663 = vrsqrt.f32 %v783_v12  ;;  %vm792_vm3 = vcmp.eq.f32.partialorder %v783_v12, inf  ;;  %v795_v30 = vand.u32 2147483648, %v783_v12  ;;  %vm794_vm4 = vcmp.eq.f32.partialorder %v783_v12, 0.0 }
 0x807   :  { %v782_v28 = vpop.xlane.xlu2 %781 }
 0x808   :  { %v1664_v9 = vpop.eup %1663  ;;  %v784_v13 = vmul.f32 0.032258064, %v782_v28  ;;  %v2048_v28 = vld [vmem:[#allocation2 + $0x158] sm:$0xff] }
 0x809   :  { %v786_v15 = vmul.f32 %v1664_v9, %v783_v12 }
 0x80a   :  { %1665 = vrsqrt.f32 %v784_v13  ;;  %vm804_vm5 = vcmp.eq.f32.partialorder %v784_v13, inf  ;;  %v807_v33 = vand.u32 2147483648, %v784_v13  ;;  %vm806_vm6 = vcmp.eq.f32.partialorder %v784_v13, 0.0 }
 0x80b   :  { %v787_v16 = vmul.f32 %v1664_v9, %v786_v15  ;;  %v2053_v15 = vld [vmem:[#allocation2 + $0x160] sm:$0xff] }
 0x80d   :  { %v788_v32 = vmul.f32 0.5, %v787_v16 }
 0x80f   :  { %v789_v17 = vsub.f32 1.5, %v788_v32  ;;  %v2057_v32 = vld [vmem:[#allocation2 + $0x168] sm:$0xff] }
 0x810   :  { %v1666_v26 = vpop.eup %1665 }
 0x811   :  { %v790_v36 = vmul.f32 %v1664_v9, %v789_v17  ;;  %v798_v19 = vmul.f32 %v1666_v26, %v784_v13 }
 0x813   :  { %v791_v21 = vmul.f32 %v790_v36, %v783_v12  ;;  %v799_v40 = vmul.f32 %v1666_v26, %v798_v19  ;;  %v2065_v19 = vld [vmem:[#allocation2 + $0x178] sm:$0xff] }
 0x815   :  { %v793_v38 = vsel %vm792_vm3, %v783_v12, %v791_v21  ;;  %v800_v24 = vmul.f32 0.5, %v799_v40  ;;  %v2069_v40 = vld [vmem:[#allocation2 + $0x180] sm:$0xff] }
 0x816   :  { %v796_v42 = vsel %vm794_vm4, %v795_v30, %v793_v38  ;;  %v2073_v38 = vld [vmem:[#allocation2 + $0x188] sm:$0xff] }
 0x817   :  { %v801_v27 = vsub.f32 1.5, %v800_v24  ;;  %v812_v29 = vadd.f32 1e-06, %v796_v42  ;;  %v2077_v42 = vld [vmem:[#allocation2 + $0x190] sm:$0xff] }
 0x819   :  { %v802_v37 = vmul.f32 %v1666_v26, %v801_v27  ;;  %1667 = vrcp.f32 %v812_v29  ;;  %v825_v46 = vand.u32 2147483648, %v812_v29  ;;  %v823_v49 = vand.u32 2147483647, %v812_v29  ;;  %v2061_v26 = vld [vmem:[#allocation2 + $0x170] sm:$0xff] }
 0x81a   :  { %vm819_vm8 = vweird.f32 %v812_v29 }
 0x81b   :  { %v803_v31 = vmul.f32 %v802_v37, %v784_v13  ;;  %v826_v14 = vor.u32 1.1754944e-38, %v825_v46  ;;  %vm824_vm10 = vcmp.eq.f32.partialorder %v823_v49, 8.507059e+37  ;;  %v1727_v37 = vld [vmem:[%s2209_s1] sm:$0xff] }
 0x81d   :  { %v805_v1 = vsel %vm804_vm5, %v784_v13, %v803_v31 }
 0x81e   :  { %v808_v39 = vsel %vm806_vm6, %v807_v33, %v805_v1 }
 0x81f   :  { %v1668_v0 = vpop.eup %1667  ;;  %v813_v41 = vadd.f32 1e-06, %v808_v39  ;;  %v1728_v39 = vld [vmem:[%s2209_s1 + $0x8] sm:$0xff]  ;;  %s1787_s1 = smov [#allocation5]  }
 0x820   :  { %v815_v43 = vmul.f32 %v1668_v0, %v812_v29  ;;  %vm820_vm7 = vweird.f32 %v1668_v0  ;;  %s1511_s4 = sshll.u32 %s1787_s1, 4  ;;  %s1512_s4 = int_to_ptr.vmem [resolvable:$true] %s1511_s4 }
 0x821   :  { %1669 = vrcp.f32 %v813_v41  ;;  %vm821_vm9 = vmor %vm819_vm8, %vm820_vm7  ;;  %v840_v57 = vand.u32 2147483648, %v813_v41  ;;  %v838_v61 = vand.u32 2147483647, %v813_v41  ;;  %vm834_vm12 = vweird.f32 %v813_v41 }
 0x822   :  { %v816_v44 = vsub.f32 1.0, %v815_v43 }
 0x823   :  { %v841_v62 = vor.u32 1.1754944e-38, %v840_v57  ;;  %vm839_vm15 = vcmp.eq.f32.partialorder %v838_v61, 8.507059e+37 }
 0x824   :  { %v817_v48 = vmul.f32 %v1668_v0, %v816_v44 }
 0x826   :  { %v818_v45 = vadd.f32 %v1668_v0, %v817_v48 }
 0x827   :  { %v1670_v51 = vpop.eup %1669 }
 0x828   :  { %v822_v35 = vsel %vm821_vm9, %v1668_v0, %v818_v45  ;;  %v830_v23 = vmul.f32 %v1670_v51, %v813_v41  ;;  %vm835_vm11 = vweird.f32 %v1670_v51 }
 0x829   :  { %v827_v53 = vsel %vm824_vm10, %v826_v14, %v822_v35  ;;  %vm836_vm13 = vmor %vm834_vm12, %vm835_vm11 }
 0x82a   :  { %v828_v54 = vmul.f32 %v827_v53, %v810_v52  ;;  %v831_v50 = vsub.f32 1.0, %v830_v23 }
 0x82c   :  { %v845_v58 = vadd.f32 %v1604_v22, %v828_v54  ;;  %v832_v59 = vmul.f32 %v1670_v51, %v831_v50 }
 0x82e   :  { %1552 = vmatmul.msk.f32.vlgmr.msrb.gmra.mxu0 %vm71_vm0, %v845_v58  ;;  %v833_v20 = vadd.f32 %v1670_v51, %v832_v59 }
 0x830   :  { %v837_v18 = vsel %vm836_vm13, %v1670_v51, %v833_v20 }
 0x831   :  { %v842_v63 = vsel %vm839_vm15, %v841_v62, %v837_v18 }
 0x832   :  { %v843_v2 = vmul.f32 %v842_v63, %v811_v34 }
 0x834   :  { %v846_v25 = vadd.f32 %v1604_v22, %v843_v2 }
 0x836   :  { %1553 = vmatmul.msk.f32.gmra.mxu0 %vm71_vm0, %v846_v25 }
 0x8ab   :  { %v871_v5 = vpop.f32.mrf.mxu0 }
 0x8ac   :  { %v2035_v55 = vadd.f32 %v1605_v4, %v871_v5 }
 0x8ae   :  { %889 = vrot.lane.b32.xlu2 %v2035_v55, %s1785_s0  ;;  %v877_v11 = vmul.f32 0.35355338, %v2035_v55 }
 0x8b0   :  { %v879_v9 = vmul.f32 %v2048_v28, %v877_v11  ;;  %v881_v17 = vmul.f32 %v2057_v32, %v877_v11  ;;  %v883_v21 = vmul.f32 %v2065_v19, %v877_v11  ;;  %v885_v24 = vmul.f32 %v2073_v38, %v877_v11 }
 0x8b3   :  { %v874_v6 = vpop.f32.mrf.mxu0 }
 0x8b4   :  { %v2039_v7 = vadd.f32 %v1605_v4, %v874_v6 }
 0x8b6   :  { %891 = vrot.lane.b32.xlu1 %v2039_v7, %s1785_s0  ;;  %v1590_v3 = vpack.i.bf16 %v2035_v55, %v2039_v7  ;;  %v878_v13 = vmul.f32 0.35355338, %v2039_v7 }
 0x8b8   :  { %v880_v16 = vmul.f32 %v2053_v15, %v878_v13  ;;  %v882_v36 = vmul.f32 %v2061_v26, %v878_v13  ;;  %v884_v30 = vmul.f32 %v2069_v40, %v878_v13  ;;  %v886_v27 = vmul.f32 %v2077_v42, %v878_v13 }
 0x908   :  { %v890_v12 = vpop.permute.xlu2 %889 }
 0x928   :  { %v892_v8 = vpop.permute.xlu1 %891 }
 0x929   :  { %1554 = vmatpush.xpose.msk.msra.mxu3 %vm71_vm0, %v892_v8 }
 0x92d   :  { %1555 = vmatpush.xpose.msk.msra.mxu3 %vm71_vm0, %v890_v12 }
 0x930   :  { %1556 = vmatmul.msk.f32.vlgmr.msra.gmra.mxu3 %vm71_vm0, %v879_v9 }
 0x938   :  { %1557 = vmatmul.msk.f32.gmra.mxu3 %vm71_vm0, %v880_v16 }
 0x940   :  { %1558 = vmatmul.msk.f32.gmra.mxu3 %vm71_vm0, %v881_v17 }
 0x948   :  { %1559 = vmatmul.msk.f32.gmra.mxu3 %vm71_vm0, %v882_v36 }
 0x950   :  { %1560 = vmatmul.msk.f32.gmra.mxu3 %vm71_vm0, %v883_v21 }
 0x958   :  { %1561 = vmatmul.msk.f32.gmra.mxu3 %vm71_vm0, %v884_v30 }
 0x960   :  { %1562 = vmatmul.msk.f32.gmra.mxu3 %vm71_vm0, %v885_v24 }
 0x968   :  { %1563 = vmatmul.msk.f32.gmra.mxu3 %vm71_vm0, %v886_v27 }
 0x9b3   :  { %v938_v29 = vpop.f32.mrf.mxu3 }
 0x9b4   :  { %v939_v31 = vadd.f32 %v1727_v37, %v938_v29 }
 0x9b6   :  { %v962_v33 = vsel %vm276_vm14, %v939_v31, -inf }
 0x9b7   :  { %963 = vmax.xlane.f32.xlu0 %v962_v33 }
 0x9bb   :  { %v941_v1 = vpop.f32.mrf.mxu3 }
 0x9bc   :  { %v942_v0 = vadd.f32 %v1728_v39, %v941_v1 }
 0x9be   :  { %v965_v41 = vsel %vm276_vm14, %v942_v0, -inf }
 0x9bf   :  { %966 = vmax.xlane.f32.xlu0 %v965_v41 }
 0x9c3   :  { %v944_v43 = vpop.f32.mrf.mxu3 }
 0x9c4   :  { %v945_v44 = vadd.f32 %v1727_v37, %v944_v43 }
 0x9c6   :  { %v968_v46 = vsel %vm276_vm14, %v945_v44, -inf }
 0x9c7   :  { %969 = vmax.xlane.f32.xlu1 %v968_v46 }
 0x9cb   :  { %v947_v47 = vpop.f32.mrf.mxu3 }
 0x9cc   :  { %v948_v48 = vadd.f32 %v1728_v39, %v947_v47 }
 0x9ce   :  { %v971_v49 = vsel %vm276_vm14, %v948_v48, -inf }
 0x9cf   :  { %972 = vmax.xlane.f32.xlu2 %v971_v49 }
 0x9d3   :  { %v950_v45 = vpop.f32.mrf.mxu3 }
 0x9d4   :  { %v951_v51 = vadd.f32 %v1727_v37, %v950_v45 }
 0x9d6   :  { %v974_v14 = vsel %vm276_vm14, %v951_v51, -inf }
 0x9d7   :  { %975 = vmax.xlane.f32.xlu0 %v974_v14 }
 0x9db   :  { %v953_v52 = vpop.f32.mrf.mxu3 }
 0x9dc   :  { %v954_v35 = vadd.f32 %v1728_v39, %v953_v52 }
 0x9de   :  { %v977_v22 = vsel %vm276_vm14, %v954_v35, -inf }
 0x9df   :  { %978 = vmax.xlane.f32.xlu0 %v977_v22 }
 0x9e3   :  { %v956_v23 = vpop.f32.mrf.mxu3 }
 0x9e4   :  { %v957_v53 = vadd.f32 %v1727_v37, %v956_v23 }
 0x9e6   :  { %v980_v54 = vsel %vm276_vm14, %v957_v53, -inf }
 0x9e7   :  { %981 = vmax.xlane.f32.xlu0 %v980_v54 }
 0x9eb   :  { %v959_v50 = vpop.f32.mrf.mxu3 }
 0x9ec   :  { %v960_v57 = vadd.f32 %v1728_v39, %v959_v50 }
 0x9ee   :  { %v983_v58 = vsel %vm276_vm14, %v960_v57, -inf }
 0x9ef   :  { %984 = vmax.xlane.f32.xlu0 %v983_v58 }
 0xa2a   :  { %v964_v59 = vpop.xlane.xlu0 %963 }
 0xa2b   :  { %v986_v61 = vsub.f32 %v939_v31, %v964_v59 }
 0xa2d   :  { %v994_v20 = vmul.f32 1.442695, %v986_v61 }
 0xa2f   :  { %1671 = vpow2.f32 %v994_v20 }
 0xa32   :  { %v967_v62 = vpop.xlane.xlu0 %966 }
 0xa33   :  { %v987_v34 = vsub.f32 %v942_v0, %v967_v62 }
 0xa35   :  { %v2095_v18 = vpop.eup %1671  ;;  %v996_v63 = vmul.f32 1.442695, %v987_v34 }
 0xa36   :  { %v1010_v2 = vsel %vm276_vm14, %v2095_v18, 0.0 }
 0xa37   :  { %1673 = vpow2.f32 %v996_v63  ;;  %1011 = vadd.xlane.f32.xlu0 %v1010_v2 }
 0xa3a   :  { %v970_v25 = vpop.xlane.xlu1 %969 }
 0xa3b   :  { %v988_v4 = vsub.f32 %v945_v44, %v970_v25 }
 0xa3d   :  { %v2099_v5 = vpop.eup %1673  ;;  %v998_v6 = vmul.f32 1.442695, %v988_v4 }
 0xa3e   :  { %v1013_v8 = vsel %vm276_vm14, %v2099_v5, 0.0 }
 0xa3f   :  { %1675 = vpow2.f32 %v998_v6  ;;  %1014 = vadd.xlane.f32.xlu2 %v1013_v8 }
 0xa42   :  { %v973_v11 = vpop.xlane.xlu2 %972 }
 0xa43   :  { %v989_v12 = vsub.f32 %v948_v48, %v973_v11 }
 0xa45   :  { %v2103_v9 = vpop.eup %1675  ;;  %v1000_v13 = vmul.f32 1.442695, %v989_v12 }
 0xa46   :  { %v1016_v16 = vsel %vm276_vm14, %v2103_v9, 0.0 }
 0xa47   :  { %1677 = vpow2.f32 %v1000_v13  ;;  %1017 = vadd.xlane.f32.xlu1 %v1016_v16 }
 0xa4a   :  { %v976_v17 = vpop.xlane.xlu0 %975 }
 0xa4b   :  { %v990_v36 = vsub.f32 %v951_v51, %v976_v17  ;;  %1591 = vrot.lane.b32.xlu0 %v1590_v3, %s1786_s26 }
 0xa4d   :  { %v2111_v21 = vpop.eup %1677  ;;  %v1002_v30 = vmul.f32 1.442695, %v990_v36 }
 0xa4e   :  { %v1019_v24 = vsel %vm276_vm14, %v2111_v21, 0.0 }
 0xa4f   :  { %1679 = vpow2.f32 %v1002_v30  ;;  %1020 = vadd.xlane.f32.xlu2 %v1019_v24 }
 0xa52   :  { %v979_v27 = vpop.xlane.xlu0 %978 }
 0xa53   :  { %v991_v29 = vsub.f32 %v954_v35, %v979_v27 }
 0xa55   :  { %v2115_v37 = vpop.eup %1679  ;;  %v1004_v31 = vmul.f32 1.442695, %v991_v29 }
 0xa56   :  { %v1022_v33 = vsel %vm276_vm14, %v2115_v37, 0.0 }
 0xa57   :  { %1681 = vpow2.f32 %v1004_v31  ;;  %1023 = vadd.xlane.f32.xlu1 %v1022_v33 }
 0xa5a   :  { %v982_v55 = vpop.xlane.xlu0 %981 }
 0xa5b   :  { %v992_v7 = vsub.f32 %v957_v53, %v982_v55 }
 0xa5d   :  { %v2119_v3 = vpop.eup %1681  ;;  %v1006_v1 = vmul.f32 1.442695, %v992_v7 }
 0xa5e   :  { %v1025_v39 = vsel %vm276_vm14, %v2119_v3, 0.0 }
 0xa5f   :  { %1683 = vpow2.f32 %v1006_v1  ;;  %1026 = vadd.xlane.f32.xlu2 %v1025_v39 }
 0xa62   :  { %v985_v0 = vpop.xlane.xlu0 %984 }
 0xa63   :  { %v993_v41 = vsub.f32 %v960_v57, %v985_v0 }
 0xa65   :  { %v2123_v43 = vpop.eup %1683  ;;  %v1008_v46 = vmul.f32 1.442695, %v993_v41 }
 0xa66   :  { %v1028_v44 = vsel %vm276_vm14, %v2123_v43, 0.0 }
 0xa67   :  { %1029 = vadd.xlane.f32.xlu1 %v1028_v44  ;;  %1685 = vpow2.f32 %v1008_v46 }
 0xa6d   :  { %v2127_v47 = vpop.eup %1685 }
 0xa6e   :  { %v1031_v48 = vsel %vm276_vm14, %v2127_v47, 0.0 }
 0xa75   :  { %1032 = vadd.xlane.f32.xlu0 %v1031_v48 }
 0xaaa   :  { %v1012_v49 = vpop.xlane.xlu0 %1011 }
 0xaab   :  { %1687 = vrcp.f32 %v1012_v49  ;;  %v1045_v23 = vand.u32 2147483648, %v1012_v49  ;;  %vm1039_vm3 = vweird.f32 %v1012_v49  ;;  %v1043_v54 = vand.u32 2147483647, %v1012_v49 }
 0xaad   :  { %v1046_v59 = vor.u32 1.1754944e-38, %v1045_v23  ;;  %vm1044_vm5 = vcmp.eq.f32.partialorder %v1043_v54, 8.507059e+37 }
 0xab1   :  { %v1688_v45 = vpop.eup %1687 }
 0xab2   :  { %v1035_v51 = vmul.f32 %v1688_v45, %v1012_v49  ;;  %v1015_v14 = vpop.xlane.xlu2 %1014  ;;  %vm1040_vm1 = vweird.f32 %v1688_v45 }
 0xab3   :  { %1689 = vrcp.f32 %v1015_v14  ;;  %vm1041_vm4 = vmor %vm1039_vm3, %vm1040_vm1  ;;  %v1060_v2 = vand.u32 2147483648, %v1015_v14  ;;  %vm1054_vm7 = vweird.f32 %v1015_v14  ;;  %v1058_v11 = vand.u32 2147483647, %v1015_v14 }
 0xab4   :  { %v1036_v52 = vsub.f32 1.0, %v1035_v51 }
 0xab5   :  { %v1061_v17 = vor.u32 1.1754944e-38, %v1060_v2  ;;  %vm1059_vm9 = vcmp.eq.f32.partialorder %v1058_v11, 8.507059e+37 }
 0xab6   :  { %v1037_v35 = vmul.f32 %v1688_v45, %v1036_v52 }
 0xab8   :  { %v1038_v22 = vadd.f32 %v1688_v45, %v1037_v35 }
 0xab9   :  { %v1690_v53 = vpop.eup %1689 }
 0xaba   :  { %v1050_v50 = vmul.f32 %v1690_v53, %v1015_v14  ;;  %v1018_v57 = vpop.xlane.xlu1 %1017  ;;  %v1042_v58 = vsel %vm1041_vm4, %v1688_v45, %v1038_v22  ;;  %vm1055_vm6 = vweird.f32 %v1690_v53 }
 0xabb   :  { %1691 = vrcp.f32 %v1018_v57  ;;  %v1047_v62 = vsel %vm1044_vm5, %v1046_v59, %v1042_v58  ;;  %vm1056_vm8 = vmor %vm1054_vm7, %vm1055_vm6  ;;  %v1075_v27 = vand.u32 2147483648, %v1018_v57  ;;  %vm1069_vm11 = vweird.f32 %v1018_v57 }
 0xabc   :  { %v1051_v61 = vsub.f32 1.0, %v1050_v50  ;;  %v1048_v8 = vmul.f32 %v2095_v18, %v1047_v62  ;;  %v1073_v33 = vand.u32 2147483647, %v1018_v57 }
 0xabd   :  { %v1592_v20 = vpop.permute.xlu0 %1591  ;;  %v1076_v39 = vor.u32 1.1754944e-38, %v1075_v27 }
 0xabe   :  { %v1052_v34 = vmul.f32 %v1690_v53, %v1051_v61  ;;  %v1593_v63 = vunpack.i.l.bf16 %v1592_v20  ;;  %v1594_v25 = vunpack.i.h.bf16 %v1592_v20  ;;  %vm1074_vm13 = vcmp.eq.f32.partialorder %v1073_v33, 8.507059e+37 }
 0xac0   :  { %1198 = vmatpush.msra.mxu0 %v1593_v63  ;;  %v1053_v4 = vadd.f32 %v1690_v53, %v1052_v34 }
 0xac1   :  { %v1692_v6 = vpop.eup %1691 }
 0xac2   :  { %v1065_v12 = vmul.f32 %v1692_v6, %v1018_v57  ;;  %v1021_v13 = vpop.xlane.xlu2 %1020  ;;  %1199 = vmatpush.msra.mxu0 %v1594_v25  ;;  %v1057_v16 = vsel %vm1056_vm8, %v1690_v53, %v1053_v4  ;;  %vm1070_vm10 = vweird.f32 %v1692_v6 }
 0xac3   :  { %1693 = vrcp.f32 %v1021_v13  ;;  %1564 = vmatmul.msk.f32.vlgmr.msra.gmra.mxu0 %vm276_vm14, %v1048_v8  ;;  %v1062_v24 = vsel %vm1059_vm9, %v1061_v17, %v1057_v16  ;;  %vm1071_vm12 = vmor %vm1069_vm11, %vm1070_vm10  ;;  %v1090_v46 = vand.u32 2147483648, %v1021_v13  ;;  %vm1084_vm1 = vweird.f32 %v1021_v13 }
 0xac4   :  { %v1066_v36 = vsub.f32 1.0, %v1065_v12  ;;  %v1063_v18 = vmul.f32 %v2099_v5, %v1062_v24  ;;  %v1088_v45 = vand.u32 2147483647, %v1021_v13 }
 0xac5   :  { %v1091_v35 = vor.u32 1.1754944e-38, %v1090_v46 }
 0xac6   :  { %v1067_v30 = vmul.f32 %v1692_v6, %v1066_v36  ;;  %vm1089_vm4 = vcmp.eq.f32.partialorder %v1088_v45, 8.507059e+37  ;;  %v744_v45 = vld [vmem:[#allocation2 + $0xe0] sm:$0xff] }
 0xac7   :  { %1257 = vmatpush.msrb.mxu2 %v744_v45 }
 0xac8   :  { %v1068_v29 = vadd.f32 %v1692_v6, %v1067_v30 }
 0xac9   :  { %v1694_v31 = vpop.eup %1693 }
 0xaca   :  { %v1080_v55 = vmul.f32 %v1694_v31, %v1021_v13  ;;  %v1024_v7 = vpop.xlane.xlu1 %1023  ;;  %v1072_v1 = vsel %vm1071_vm12, %v1692_v6, %v1068_v29  ;;  %vm1085_vm15 = vweird.f32 %v1694_v31 }
 0xacb   :  { %1695 = vrcp.f32 %v1024_v7  ;;  %1565 = vmatmul.msk.f32.gmra.mxu0 %vm276_vm14, %v1063_v18  ;;  %v1077_v44 = vsel %vm1074_vm13, %v1076_v39, %v1072_v1  ;;  %vm1086_vm3 = vmor %vm1084_vm1, %vm1085_vm15  ;;  %v1105_v54 = vand.u32 2147483648, %v1024_v7  ;;  %vm1099_vm6 = vweird.f32 %v1024_v7 }
 0xacc   :  { %v1081_v0 = vsub.f32 1.0, %v1080_v55  ;;  %v1078_v5 = vmul.f32 %v2103_v9, %v1077_v44  ;;  %v1103_v58 = vand.u32 2147483647, %v1024_v7 }
 0xacd   :  { %v1106_v62 = vor.u32 1.1754944e-38, %v1105_v54 }
 0xace   :  { %v1082_v41 = vmul.f32 %v1694_v31, %v1081_v0  ;;  %vm1104_vm8 = vcmp.eq.f32.partialorder %v1103_v58, 8.507059e+37 }
 0xad0   :  { %v1083_v48 = vadd.f32 %v1694_v31, %v1082_v41 }
 0xad1   :  { %v1696_v49 = vpop.eup %1695 }
 0xad2   :  { %v1095_v51 = vmul.f32 %v1696_v49, %v1024_v7  ;;  %v1027_v14 = vpop.xlane.xlu2 %1026  ;;  %v1087_v52 = vsel %vm1086_vm3, %v1694_v31, %v1083_v48  ;;  %vm1100_vm5 = vweird.f32 %v1696_v49 }
 0xad3   :  { %1697 = vrcp.f32 %v1027_v14  ;;  %1566 = vmatmul.msk.f32.gmra.mxu0 %vm276_vm14, %v1078_v5  ;;  %v1092_v53 = vsel %vm1089_vm4, %v1091_v35, %v1087_v52  ;;  %vm1101_vm7 = vmor %vm1099_vm6, %vm1100_vm5  ;;  %v1120_v25 = vand.u32 2147483648, %v1027_v14  ;;  %vm1114_vm10 = vweird.f32 %v1027_v14 }
 0xad4   :  { %v1096_v22 = vsub.f32 1.0, %v1095_v51  ;;  %v1093_v9 = vmul.f32 %v2111_v21, %v1092_v53  ;;  %v1118_v8 = vand.u32 2147483647, %v1027_v14 }
 0xad5   :  { %v1121_v13 = vor.u32 1.1754944e-38, %v1120_v25 }
 0xad6   :  { %v1097_v23 = vmul.f32 %v1696_v49, %v1096_v22  ;;  %vm1119_vm12 = vcmp.eq.f32.partialorder %v1118_v8, 8.507059e+37  ;;  %v741_v22 = vld [vmem:[#allocation2 + $0xc8] sm:$0xff] }
 0xad8   :  { %v1098_v50 = vadd.f32 %v1696_v49, %v1097_v23 }
 0xad9   :  { %v1698_v57 = vpop.eup %1697 }
 0xada   :  { %v1110_v59 = vmul.f32 %v1698_v57, %v1027_v14  ;;  %v1030_v61 = vpop.xlane.xlu1 %1029  ;;  %v1102_v20 = vsel %vm1101_vm7, %v1696_v49, %v1098_v50  ;;  %vm1115_vm9 = vweird.f32 %v1698_v57  ;;  %v742_v14 = vld [vmem:[#allocation2 + $0xd0] sm:$0xff] }
 0xadb   :  { %1699 = vrcp.f32 %v1030_v61  ;;  %1567 = vmatmul.msk.f32.gmra.mxu0 %vm276_vm14, %v1093_v9  ;;  %v1107_v2 = vsel %vm1104_vm8, %v1106_v62, %v1102_v20  ;;  %vm1116_vm11 = vmor %vm1114_vm10, %vm1115_vm9  ;;  %v1135_v30 = vand.u32 2147483648, %v1030_v61  ;;  %vm1129_vm15 = vweird.f32 %v1030_v61 }
 0xadc   :  { %v1111_v34 = vsub.f32 1.0, %v1110_v59  ;;  %v1108_v21 = vmul.f32 %v2115_v37, %v1107_v2  ;;  %v1133_v37 = vand.u32 2147483647, %v1030_v61 }
 0xadd   :  { %v1136_v18 = vor.u32 1.1754944e-38, %v1135_v30 }
 0xade   :  { %v1112_v63 = vmul.f32 %v1698_v57, %v1111_v34  ;;  %vm1134_vm3 = vcmp.eq.f32.partialorder %v1133_v37, 8.507059e+37  ;;  %v746_v37 = vld [vmem:[#allocation2 + $0xf0] sm:$0xff] }
 0xae0   :  { %v1113_v4 = vadd.f32 %v1698_v57, %v1112_v63 }
 0xae1   :  { %v1700_v6 = vpop.eup %1699 }
 0xae2   :  { %v1125_v11 = vmul.f32 %v1700_v6, %v1030_v61  ;;  %v1117_v12 = vsel %vm1116_vm11, %v1698_v57, %v1113_v4  ;;  %vm1130_vm13 = vweird.f32 %v1700_v6  ;;  %v1606_v4 = vld [vmem:[#allocation2 + $0x149] ss:$0 sm:$0xff] }
 0xae3   :  { %1568 = vmatmul.msk.f32.gmra.mxu0 %vm276_vm14, %v1108_v21  ;;  %v1122_v36 = vsel %vm1119_vm12, %v1121_v13, %v1117_v12  ;;  %vm1131_vm1 = vmor %vm1129_vm15, %vm1130_vm13 }
 0xae4   :  { %v1126_v16 = vsub.f32 1.0, %v1125_v11  ;;  %v1123_v29 = vmul.f32 %v2119_v3, %v1122_v36  ;;  %v748_v11 = vld [vmem:[#allocation2 + $0x100] sm:$0xff] }
 0xae5   :  { %1374 = vmatpush.msra.mxu1 %v748_v11 }
 0xae6   :  { %v1127_v17 = vmul.f32 %v1700_v6, %v1126_v16 }
 0xae8   :  { %v1033_v24 = vpop.xlane.xlu0 %1032  ;;  %v1128_v27 = vadd.f32 %v1700_v6, %v1127_v17 }
 0xae9   :  { %1701 = vrcp.f32 %v1033_v24  ;;  %v1150_v0 = vand.u32 2147483648, %v1033_v24  ;;  %v1148_v44 = vand.u32 2147483647, %v1033_v24  ;;  %vm1144_vm5 = vweird.f32 %v1033_v24 }
 0xaea   :  { %v1132_v31 = vsel %vm1131_vm1, %v1700_v6, %v1128_v27 }
 0xaeb   :  { %1569 = vmatmul.msk.f32.gmra.mxu0 %vm276_vm14, %v1123_v29  ;;  %v1137_v33 = vsel %vm1134_vm3, %v1136_v18, %v1132_v31  ;;  %v1151_v46 = vor.u32 1.1754944e-38, %v1150_v0  ;;  %vm1149_vm7 = vcmp.eq.f32.partialorder %v1148_v44, 8.507059e+37  ;;  %v747_v29 = vld [vmem:[#allocation2 + $0xf8] sm:$0xff]  ;;  %v745_v31 = vld [vmem:[#allocation2 + $0xe8] sm:$0xff] }
 0xaec   :  { %v1138_v1 = vmul.f32 %v2123_v43, %v1137_v33  ;;  %v743_v43 = vld [vmem:[#allocation2 + $0xd8] sm:$0xff]  ;;  %1375 = vmatpush.msra.mxu1 %v747_v29 }
 0xaed   :  { %1258 = vmatpush.msrb.mxu2 %v743_v43 }
 0xaee   :  { %1376 = vmatpush.msra.mxu1 %v746_v37 }
 0xaef   :  { %v1702_v55 = vpop.eup %1701  ;;  %1259 = vmatpush.msrb.mxu2 %v742_v14 }
 0xaf0   :  { %v1140_v7 = vmul.f32 %v1702_v55, %v1033_v24  ;;  %vm1145_vm4 = vweird.f32 %v1702_v55  ;;  %1377 = vmatpush.msra.mxu1 %v745_v31  ;;  %v751_v31 = vld [vmem:[#allocation2 + $0x118] sm:$0xff] }
 0xaf1   :  { %vm1146_vm6 = vmor %vm1144_vm5, %vm1145_vm4  ;;  %1260 = vmatpush.msrb.mxu2 %v741_v22  ;;  %v755_v22 = vld [vmem:[#allocation2 + $0x138] sm:$0xff] }
 0xaf2   :  { %v1141_v39 = vsub.f32 1.0, %v1140_v7 }
 0xaf3   :  { %1570 = vmatmul.msk.f32.gmra.mxu0 %vm276_vm14, %v1138_v1 }
 0xaf4   :  { %v1142_v41 = vmul.f32 %v1702_v55, %v1141_v39 }
 0xaf6   :  { %v1143_v3 = vadd.f32 %v1702_v55, %v1142_v41 }
 0xaf8   :  { %v1147_v48 = vsel %vm1146_vm6, %v1702_v55, %v1143_v3 }
 0xaf9   :  { %v1152_v49 = vsel %vm1149_vm7, %v1151_v46, %v1147_v48 }
 0xafa   :  { %v1153_v5 = vmul.f32 %v2127_v47, %v1152_v49 }
 0xafc   :  { %1571 = vmatmul.msk.f32.gmra.mxu0 %vm276_vm14, %v1153_v5 }
 0xb40   :  { %v1201_v51 = vpop.f32.mrf.mxu0 }
 0xb41   :  { %v1225_v47 = vmul.f32 %v2048_v28, %v1201_v51 }
 0xb48   :  { %v1204_v52 = vpop.f32.mrf.mxu0 }
 0xb49   :  { %v1226_v34 = vmul.f32 %v2053_v15, %v1204_v52 }
 0xb50   :  { %v1207_v35 = vpop.f32.mrf.mxu0 }
 0xb51   :  { %v1227_v50 = vmul.f32 %v2057_v32, %v1207_v35  ;;  %v756_v35 = vld [vmem:[#allocation2 + $0x140] sm:$0xff] }
 0xb52   :  { %1401 = vmatpush.msra.mxu2 %v756_v35 }
 0xb53   :  { %v1233_v9 = vadd.f32 %v1227_v50, %v1225_v47  ;;  %v753_v50 = vld [vmem:[#allocation2 + $0x128] sm:$0xff] }
 0xb54   :  { %1402 = vmatpush.msra.mxu2 %v755_v22 }
 0xb58   :  { %v1210_v23 = vpop.f32.mrf.mxu0 }
 0xb59   :  { %v1228_v62 = vmul.f32 %v2061_v26, %v1210_v23 }
 0xb5b   :  { %v1234_v2 = vadd.f32 %v1228_v62, %v1226_v34 }
 0xb60   :  { %v1213_v53 = vpop.f32.mrf.mxu0 }
 0xb61   :  { %v1229_v57 = vmul.f32 %v2065_v19, %v1213_v53  ;;  %v754_v53 = vld [vmem:[#allocation2 + $0x130] sm:$0xff] }
 0xb62   :  { %1403 = vmatpush.msra.mxu2 %v754_v53 }
 0xb63   :  { %v1235_v59 = vadd.f32 %v1233_v9, %v1229_v57  ;;  %v752_v9 = vld [vmem:[#allocation2 + $0x120] sm:$0xff] }
 0xb64   :  { %1404 = vmatpush.msra.mxu2 %v753_v50 }
 0xb66   :  { %1405 = vmatpush.msra.mxu2 %v752_v9 }
 0xb68   :  { %v1216_v54 = vpop.f32.mrf.mxu0  ;;  %1406 = vmatpush.msra.mxu2 %v751_v31 }
 0xb69   :  { %v1230_v63 = vmul.f32 %v2069_v40, %v1216_v54 }
 0xb6b   :  { %v1236_v25 = vadd.f32 %v1234_v2, %v1230_v63  ;;  %v1607_v2 = vld [vmem:[#allocation2 + $0x14e] ss:$0 sm:$0xff] }
 0xb70   :  { %v1219_v58 = vpop.f32.mrf.mxu0 }
 0xb71   :  { %v1231_v61 = vmul.f32 %v2073_v38, %v1219_v58 }
 0xb73   :  { %v1237_v20 = vadd.f32 %v1235_v59, %v1231_v61 }
 0xb75   :  { %1572 = vmatmul.msk.f32.vlgmr.msrb.gmra.mxu2 %vm71_vm0, %v1237_v20 }
 0xb79   :  { %v1222_v32 = vpop.f32.mrf.mxu0 }
 0xb7a   :  { %v1232_v28 = vmul.f32 %v2077_v42, %v1222_v32 }
 0xb7c   :  { %v1238_v19 = vadd.f32 %v1236_v25, %v1232_v28 }
 0xb7e   :  { %1573 = vmatmul.msk.f32.gmra.mxu2 %vm71_vm0, %v1238_v19 }
 0xbf8   :  { %v1262_v6 = vpop.f32.mrf.mxu2 }
 0xbf9   :  { %v1268_v38 = vadd.f32 %v1262_v6, %v2008_v56 }
 0xbfb   :  { %v2158_v21 = vadd.f32 %v1606_v4, %v1268_v38 }
 0xbfd   :  { %v1273_v26 = vsel %vm71_vm0, %v2158_v21, 0.0 }
 0xbfe   :  { %1274 = vadd.xlane.f32.xlu2 %v1273_v26  ;;  %v1608_v26 = vld [vmem:[#allocation2 + $0x14f] ss:$0 sm:$0xff] }
 0xc01   :  { %v1265_v15 = vpop.f32.mrf.mxu2 }
 0xc02   :  { %v1269_v40 = vadd.f32 %v1265_v15, %v2013_v60 }
 0xc04   :  { %v2163_v8 = vadd.f32 %v1606_v4, %v1269_v40 }
 0xc06   :  { %v1276_v42 = vsel %vm71_vm0, %v2163_v8, 0.0 }
 0xc07   :  { %1277 = vadd.xlane.f32.xlu1 %v1276_v42 }
 0xc71   :  { %v1275_v12 = vpop.xlane.xlu2 %1274 }
 0xc72   :  { %v1279_v56 = vmul.f32 %v1275_v12, %v1828_v10 }
 0xc74   :  { %v2169_v13 = vsub.f32 %v2158_v21, %v1279_v56 }
 0xc76   :  { %v1283_v16 = vmul.f32 %v2169_v13, %v2169_v13  ;;  %v1318_v6 = vmul.f32 %v1607_v2, %v2169_v13 }
 0xc78   :  { %v1285_v17 = vsel %vm71_vm0, %v1283_v16, 0.0 }
 0xc79   :  { %1286 = vadd.xlane.f32.xlu2 %v1285_v17 }
 0xc7a   :  { %v1278_v60 = vpop.xlane.xlu1 %1277 }
 0xc7b   :  { %v1280_v36 = vmul.f32 %v1278_v60, %v1828_v10 }
 0xc7d   :  { %v2176_v30 = vsub.f32 %v2163_v8, %v1280_v36 }
 0xc7f   :  { %v1284_v24 = vmul.f32 %v2176_v30, %v2176_v30  ;;  %v1319_v13 = vmul.f32 %v1607_v2, %v2176_v30 }
 0xc81   :  { %v1288_v27 = vsel %vm71_vm0, %v1284_v24, 0.0 }
 0xc82   :  { %1289 = vadd.xlane.f32.xlu1 %v1288_v27 }
 0xcec   :  { %v1287_v18 = vpop.xlane.xlu2 %1286 }
 0xced   :  { %v1291_v33 = vmul.f32 0.032258064, %v1287_v18  ;;  %v750_v18 = vld [vmem:[#allocation2 + $0x110] sm:$0xff] }
 0xcee   :  { %1407 = vmatpush.msra.mxu2 %v750_v18 }
 0xcef   :  { %1703 = vrsqrt.f32 %v1291_v33  ;;  %vm1300_vm14 = vcmp.eq.f32.partialorder %v1291_v33, inf  ;;  %v1303_v5 = vand.u32 2147483648, %v1291_v33  ;;  %vm1302_vm8 = vcmp.eq.f32.partialorder %v1291_v33, 0.0 }
 0xcf5   :  { %v1704_v55 = vpop.eup %1703  ;;  %v1290_v7 = vpop.xlane.xlu1 %1289 }
 0xcf6   :  { %v1294_v1 = vmul.f32 %v1704_v55, %v1291_v33  ;;  %v1292_v39 = vmul.f32 0.032258064, %v1290_v7 }
 0xcf8   :  { %v1295_v0 = vmul.f32 %v1704_v55, %v1294_v1  ;;  %1705 = vrsqrt.f32 %v1292_v39  ;;  %vm1312_vm9 = vcmp.eq.f32.partialorder %v1292_v39, inf  ;;  %v1315_v57 = vand.u32 2147483648, %v1292_v39 }
 0xcf9   :  { %vm1314_vm10 = vcmp.eq.f32.partialorder %v1292_v39, 0.0 }
 0xcfa   :  { %v1296_v41 = vmul.f32 0.5, %v1295_v0 }
 0xcfc   :  { %v1297_v44 = vsub.f32 1.5, %v1296_v41 }
 0xcfe   :  { %v1706_v3 = vpop.eup %1705  ;;  %v1298_v46 = vmul.f32 %v1704_v55, %v1297_v44  ;;  %v1609_v55 = vld [vmem:[#allocation2 + $0x14a] ss:$0 sm:$0xff]  ;;  %v1610_v44 = vld [vmem:[#allocation2 + $0x14b] ss:$0 sm:$0xff] }
 0xcff   :  { %v1306_v48 = vmul.f32 %v1706_v3, %v1292_v39 }
 0xd00   :  { %v1299_v49 = vmul.f32 %v1298_v46, %v1291_v33 }
 0xd01   :  { %v1307_v45 = vmul.f32 %v1706_v3, %v1306_v48 }
 0xd02   :  { %v1301_v43 = vsel %vm1300_vm14, %v1291_v33, %v1299_v49  ;;  %v749_v33 = vld [vmem:[#allocation2 + $0x108] sm:$0xff] }
 0xd03   :  { %v1304_v51 = vsel %vm1302_vm8, %v1303_v5, %v1301_v43  ;;  %v1308_v14 = vmul.f32 0.5, %v1307_v45  ;;  %1408 = vmatpush.msra.mxu2 %v749_v33 }
 0xd04   :  { %v1320_v52 = vadd.f32 1e-06, %v1304_v51 }
 0xd05   :  { %v1309_v23 = vsub.f32 1.5, %v1308_v14 }
 0xd06   :  { %1707 = vrcp.f32 %v1320_v52  ;;  %v1333_v63 = vand.u32 2147483648, %v1320_v52  ;;  %v1331_v25 = vand.u32 2147483647, %v1320_v52  ;;  %vm1327_vm12 = vweird.f32 %v1320_v52 }
 0xd07   :  { %v1310_v54 = vmul.f32 %v1706_v3, %v1309_v23 }
 0xd08   :  { %v1334_v19 = vor.u32 1.1754944e-38, %v1333_v63  ;;  %vm1332_vm15 = vcmp.eq.f32.partialorder %v1331_v25, 8.507059e+37 }
 0xd09   :  { %v1311_v47 = vmul.f32 %v1310_v54, %v1292_v39 }
 0xd0b   :  { %v1313_v58 = vsel %vm1312_vm9, %v1292_v39, %v1311_v47 }
 0xd0c   :  { %v1708_v59 = vpop.eup %1707  ;;  %v1316_v61 = vsel %vm1314_vm10, %v1315_v57, %v1313_v58 }
 0xd0d   :  { %v1323_v20 = vmul.f32 %v1708_v59, %v1320_v52  ;;  %v1321_v62 = vadd.f32 1e-06, %v1316_v61  ;;  %vm1328_vm11 = vweird.f32 %v1708_v59 }
 0xd0e   :  { %vm1329_vm13 = vmor %vm1327_vm12, %vm1328_vm11 }
 0xd0f   :  { %v1324_v34 = vsub.f32 1.0, %v1323_v20  ;;  %1709 = vrcp.f32 %v1321_v62  ;;  %v1348_v56 = vand.u32 2147483648, %v1321_v62  ;;  %v1346_v17 = vand.u32 2147483647, %v1321_v62 }
 0xd10   :  { %vm1342_vm3 = vweird.f32 %v1321_v62 }
 0xd11   :  { %v1325_v32 = vmul.f32 %v1708_v59, %v1324_v34  ;;  %v1349_v36 = vor.u32 1.1754944e-38, %v1348_v56  ;;  %vm1347_vm5 = vcmp.eq.f32.partialorder %v1346_v17, 8.507059e+37 }
 0xd13   :  { %v1326_v28 = vadd.f32 %v1708_v59, %v1325_v32 }
 0xd15   :  { %v1710_v4 = vpop.eup %1709  ;;  %v1330_v38 = vsel %vm1329_vm13, %v1708_v59, %v1326_v28 }
 0xd16   :  { %v1335_v15 = vsel %vm1332_vm15, %v1334_v19, %v1330_v38  ;;  %v1338_v40 = vmul.f32 %v1710_v4, %v1321_v62  ;;  %vm1343_vm1 = vweird.f32 %v1710_v4 }
 0xd17   :  { %v1336_v42 = vmul.f32 %v1335_v15, %v1318_v6  ;;  %vm1344_vm4 = vmor %vm1342_vm3, %vm1343_vm1 }
 0xd18   :  { %v1339_v11 = vsub.f32 1.0, %v1338_v40 }
 0xd19   :  { %v1353_v12 = vadd.f32 %v1608_v26, %v1336_v42 }
 0xd1a   :  { %v1340_v16 = vmul.f32 %v1710_v4, %v1339_v11 }
 0xd1b   :  { %1574 = vmatmul.msk.f32.vlgmr.msra.gmra.mxu1 %vm71_vm0, %v1353_v12 }
 0xd1c   :  { %v1341_v60 = vadd.f32 %v1710_v4, %v1340_v16 }
 0xd1e   :  { %v1345_v24 = vsel %vm1344_vm4, %v1710_v4, %v1341_v60 }
 0xd1f   :  { %v1350_v27 = vsel %vm1347_vm5, %v1349_v36, %v1345_v24 }
 0xd20   :  { %v1351_v29 = vmul.f32 %v1350_v27, %v1319_v13  ;;  %v1611_v13 = vld [vmem:[#allocation2 + $0x150] ss:$0 sm:$0xff] }
 0xd22   :  { %v1354_v37 = vadd.f32 %v1608_v26, %v1351_v29 }
 0xd24   :  { %1575 = vmatmul.msk.f32.gmra.mxu1 %vm71_vm0, %v1354_v37 }
 0xd98   :  { %v1379_v7 = vpop.f32.mrf.mxu1 }
 0xd99   :  { %v1380_v1 = vadd.f32 %v1609_v55, %v1379_v7 }
 0xd9b   :  { %v1385_v39 = vmax.f32 %v1380_v1, 0.0 }
 0xd9d   :  { %1576 = vmatmul.msk.f32.vlgmr.msra.gmra.mxu2 %vm702_vm2, %v1385_v39 }
 0xda1   :  { %v1382_v30 = vpop.f32.mrf.mxu1 }
 0xda2   :  { %v1383_v0 = vadd.f32 %v1609_v55, %v1382_v30  ;;  %v1612_v55 = vld [vmem:[#allocation2 + $0x151] ss:$0 sm:$0xff] }
 0xda4   :  { %v1386_v41 = vmax.f32 %v1383_v0, 0.0 }
 0xda6   :  { %1577 = vmatmul.msk.f32.gmra.mxu2 %vm702_vm2, %v1386_v41 }
 0xe20   :  { %v1410_v3 = vpop.f32.mrf.mxu2 }
 0xe21   :  { %v1416_v46 = vadd.f32 %v1410_v3, %v2158_v21 }
 0xe23   :  { %v1419_v48 = vadd.f32 %v1610_v44, %v1416_v46 }
 0xe25   :  { %v1423_v49 = vsel %vm71_vm0, %v1419_v48, 0.0 }
 0xe26   :  { %1424 = vadd.xlane.f32.xlu2 %v1423_v49 }
 0xe29   :  { %v1413_v5 = vpop.f32.mrf.mxu2 }
 0xe2a   :  { %v1417_v45 = vadd.f32 %v1413_v5, %v2163_v8 }
 0xe2c   :  { %v1420_v43 = vadd.f32 %v1610_v44, %v1417_v45 }
 0xe2e   :  { %v1426_v51 = vsel %vm71_vm0, %v1420_v43, 0.0 }
 0xe2f   :  { %1427 = vadd.xlane.f32.xlu1 %v1426_v51 }
 0xe99   :  { %v1425_v14 = vpop.xlane.xlu2 %1424 }
 0xe9a   :  { %v1429_v52 = vmul.f32 %v1425_v14, %v1828_v10 }
 0xe9c   :  { %v1431_v35 = vsub.f32 %v1419_v48, %v1429_v52 }
 0xe9e   :  { %v1433_v22 = vmul.f32 %v1431_v35, %v1431_v35  ;;  %v1468_v18 = vmul.f32 %v1611_v13, %v1431_v35 }
 0xea0   :  { %v1435_v23 = vsel %vm71_vm0, %v1433_v22, 0.0 }
 0xea1   :  { %1436 = vadd.xlane.f32.xlu2 %v1435_v23 }
 0xea2   :  { %v1428_v21 = vpop.xlane.xlu1 %1427 }
 0xea3   :  { %v1430_v53 = vmul.f32 %v1428_v21, %v1828_v10 }
 0xea5   :  { %v2194_v54 = vsub.f32 %v1420_v43, %v1430_v53 }
 0xea7   :  { %v1434_v8 = vmul.f32 %v2194_v54, %v2194_v54  ;;  %v1469_v49 = vmul.f32 %v1611_v13, %v2194_v54 }
 0xea9   :  { %v1438_v50 = vsel %vm71_vm0, %v1434_v8, 0.0 }
 0xeaa   :  { %1439 = vadd.xlane.f32.xlu1 %v1438_v50 }
 0xf14   :  { %v1437_v47 = vpop.xlane.xlu2 %1436 }
 0xf15   :  { %v1441_v57 = vmul.f32 0.032258064, %v1437_v47 }
 0xf17   :  { %1711 = vrsqrt.f32 %v1441_v57  ;;  %vm1450_vm2 = vcmp.eq.f32.partialorder %v1441_v57, inf  ;;  %v1453_v25 = vand.u32 2147483648, %v1441_v57  ;;  %vm1452_vm6 = vcmp.eq.f32.partialorder %v1441_v57, 0.0 }
 0xf1d   :  { %v1712_v9 = vpop.eup %1711  ;;  %v1440_v58 = vpop.xlane.xlu1 %1439 }
 0xf1e   :  { %v1444_v59 = vmul.f32 %v1712_v9, %v1441_v57  ;;  %v1442_v61 = vmul.f32 0.032258064, %v1440_v58 }
 0xf20   :  { %v1445_v20 = vmul.f32 %v1712_v9, %v1444_v59  ;;  %1713 = vrsqrt.f32 %v1442_v61  ;;  %vm1462_vm7 = vcmp.eq.f32.partialorder %v1442_v61, inf  ;;  %v1465_v42 = vand.u32 2147483648, %v1442_v61 }
 0xf21   :  { %vm1464_vm14 = vcmp.eq.f32.partialorder %v1442_v61, 0.0 }
 0xf22   :  { %v1446_v62 = vmul.f32 0.5, %v1445_v20 }
 0xf24   :  { %v1447_v34 = vsub.f32 1.5, %v1446_v62 }
 0xf26   :  { %v1714_v10 = vpop.eup %1713  ;;  %v1448_v63 = vmul.f32 %v1712_v9, %v1447_v34 }
 0xf27   :  { %v1456_v2 = vmul.f32 %v1714_v10, %v1442_v61 }
 0xf28   :  { %v1449_v32 = vmul.f32 %v1448_v63, %v1441_v57 }
 0xf29   :  { %v1457_v28 = vmul.f32 %v1714_v10, %v1456_v2 }
 0xf2a   :  { %v1451_v19 = vsel %vm1450_vm2, %v1441_v57, %v1449_v32 }
 0xf2b   :  { %v1454_v4 = vsel %vm1452_vm6, %v1453_v25, %v1451_v19  ;;  %v1458_v6 = vmul.f32 0.5, %v1457_v28 }
 0xf2c   :  { %v1470_v38 = vadd.f32 1e-06, %v1454_v4 }
 0xf2d   :  { %v1459_v26 = vsub.f32 1.5, %v1458_v6 }
 0xf2e   :  { %1715 = vrcp.f32 %v1470_v38  ;;  %v1483_v36 = vand.u32 2147483648, %v1470_v38  ;;  %v1481_v27 = vand.u32 2147483647, %v1470_v38  ;;  %vm1477_vm9 = vweird.f32 %v1470_v38 }
 0xf2f   :  { %v1460_v15 = vmul.f32 %v1714_v10, %v1459_v26 }
 0xf30   :  { %v1484_v37 = vor.u32 1.1754944e-38, %v1483_v36  ;;  %vm1482_vm11 = vcmp.eq.f32.partialorder %v1481_v27, 8.507059e+37 }
 0xf31   :  { %v1461_v40 = vmul.f32 %v1460_v15, %v1442_v61 }
 0xf33   :  { %v1463_v11 = vsel %vm1462_vm7, %v1442_v61, %v1461_v40 }
 0xf34   :  { %v1716_v12 = vpop.eup %1715  ;;  %v1466_v56 = vsel %vm1464_vm14, %v1465_v42, %v1463_v11 }
 0xf35   :  { %v1471_v16 = vadd.f32 1e-06, %v1466_v56  ;;  %v1473_v17 = vmul.f32 %v1716_v12, %v1470_v38  ;;  %vm1478_vm8 = vweird.f32 %v1716_v12 }
 0xf36   :  { %vm1479_vm10 = vmor %vm1477_vm9, %vm1478_vm8 }
 0xf37   :  { %1717 = vrcp.f32 %v1471_v16  ;;  %v1474_v60 = vsub.f32 1.0, %v1473_v17  ;;  %v1498_v0 = vand.u32 2147483648, %v1471_v16  ;;  %v1496_v3 = vand.u32 2147483647, %v1471_v16 }
 0xf38   :  { %vm1492_vm13 = vweird.f32 %v1471_v16 }
 0xf39   :  { %v1475_v24 = vmul.f32 %v1716_v12, %v1474_v60  ;;  %v1499_v48 = vor.u32 1.1754944e-38, %v1498_v0  ;;  %vm1497_vm1 = vcmp.eq.f32.partialorder %v1496_v3, 8.507059e+37 }
 0xf3b   :  { %v1476_v29 = vadd.f32 %v1716_v12, %v1475_v24 }
 0xf3d   :  { %v1718_v31 = vpop.eup %1717  ;;  %v1480_v33 = vsel %vm1479_vm10, %v1716_v12, %v1476_v29 }
 0xf3e   :  { %v1485_v7 = vsel %vm1482_vm11, %v1484_v37, %v1480_v33  ;;  %v1488_v1 = vmul.f32 %v1718_v31, %v1471_v16  ;;  %vm1493_vm12 = vweird.f32 %v1718_v31 }
 0xf3f   :  { %v1486_v39 = vmul.f32 %v1485_v7, %v1468_v18  ;;  %vm1494_vm15 = vmor %vm1492_vm13, %vm1493_vm12 }
 0xf40   :  { %v1489_v30 = vsub.f32 1.0, %v1488_v1 }
 0xf41   :  { %v1503_v41 = vadd.f32 %v1612_v55, %v1486_v39 }
 0xf42   :  { %v1490_v44 = vmul.f32 %v1718_v31, %v1489_v30 }
 0xf43   :  { %1505 = vst.msk [vmem:[#allocation5] sm:$0xff] %vm71_vm0, %v1503_v41 }
 0xf44   :  { %v1491_v46 = vadd.f32 %v1718_v31, %v1490_v44 }
 0xf46   :  { %v1495_v5 = vsel %vm1494_vm15, %v1718_v31, %v1491_v46 }
 0xf47   :  { %v1500_v45 = vsel %vm1497_vm1, %v1499_v48, %v1495_v5 }
 0xf48   :  { %v1501_v43 = vmul.f32 %v1500_v45, %v1469_v49 }
 0xf4a   :  { %v1504_v51 = vadd.f32 %v1612_v55, %v1501_v43 }
 0xf4c   :  { %1506 = vst.msk [vmem:[#allocation5 + $0x8] sm:$0xff] %vm71_vm0, %v1504_v51 }
 0xf4d   :  { %1519 = dma.vmem_to_hbm [thread:$0]  %s1512_s4, 256, %s1514_s7, [#allocation4], %s1782_s17, %s1782_s17, %s1783_s18  }
 0xf4e   :  { %1779 = dma.done.wait [#allocation4], 256  }
 0xf4f   :  { %1780 = vsyncadd [#allocation4], 4294967040 }
 0xf50   :  { %1524 = vsyncpa [#allocation3], 1 }
 0xf51   :  { %1525 = vsyncpa [#allocation4], 1 }

</bundles_post_ra>
